<compile_context>
chip_gen: v7x
topology: tpu7x:2x2x1
jax: 0.10.0
libtpu: 0.0.40
codegen_flags: <defaults>
</compile_context>

<pallas_src>
import functools

import numpy as np
import jax
import jax.numpy as jnp
from jax.experimental import pallas as pl
from jax.experimental.pallas import tpu as pltpu


def _gelu_exact(x):
    # nn.GELU() default is the exact erf formulation.
    return 0.5 * x * (1.0 + jax.lax.erf(x * (1.0 / np.sqrt(2.0))))


def qkv_attn_kernel(x_ref, wqkv_ref, w12_ref, vecs_ref, mask_ref, o_ref,
                    *, n_batch, hw, c, headc, approx_gelu):
    x = x_ref[...]                                  # (rows, c) f32 flattened rows
    wqkv = wqkv_ref[...]                            # (c, 3c) bf16  [Q_all|K_all|V_all]
    w12 = w12_ref[...]                              # (c, 2c) bf16  [W1 | W2]
    vecs = vecs_ref[...]                            # (8, 3c) f32 packed small vectors
    mask = mask_ref[...]                            # (c, c) bf16 block-diag head mask
    mask_f = mask.astype(jnp.float32)

    bqkv = vecs[0:1, :]                             # (1, 3c)
    kg, kb = vecs[1:2, :c], vecs[2:3, :c]           # per-head LN params, tiled to (1,c)
    vg, vb = vecs[3:4, :c], vecs[4:5, :c]
    b1, b2 = vecs[5:6, :c], vecs[6:7, :c]

    inv_headc = 1.0 / headc
    inv_hw = 1.0 / hw
    x_bf = x.astype(jnp.bfloat16)

    # Fused qkv projection (bf16 MXU, f32 accumulate); output layout [Q|K|V],
    # head-major inside each.
    qkv = jnp.dot(x_bf, wqkv, preferred_element_type=jnp.float32) + bqkv
    q = qkv[:, 0:c]
    k = qkv[:, c:2 * c]
    v = qkv[:, 2 * c:3 * c]

    # Per-head LayerNorm (PyTorch semantics: biased variance, eps inside rsqrt).
    # Segmented mean/var over each head's `headc` channels via block-diagonal matmuls
    # (0/1 mask weights are exact in bf16); centering/normalization stays f32.
    def seg_ln(t, gamma, beta):
        mu = jnp.dot(t.astype(jnp.bfloat16), mask,
                     preferred_element_type=jnp.float32) * inv_headc
        xc = t - mu
        var = jnp.dot((xc * xc).astype(jnp.bfloat16), mask,
                      preferred_element_type=jnp.float32) * inv_headc
        return xc * jax.lax.rsqrt(var + 1e-5) * gamma + beta

    k = seg_ln(k, kg, kb)
    v = seg_ln(v, vg, vb)

    # Head attention as full-width block-diagonal matmuls, batched over the batch dim
    # (the only place the per-batch boundary matters).
    q3 = q.astype(jnp.bfloat16).reshape(n_batch, hw, c)
    k3 = k.astype(jnp.bfloat16).reshape(n_batch, hw, c)
    v3 = v.astype(jnp.bfloat16).reshape(n_batch, hw, c)
    kv = jnp.einsum('bnd,bne->bde', k3, v3, preferred_element_type=jnp.float32)
    kv = (kv * mask_f * inv_hw).astype(jnp.bfloat16)  # keep only within-head blocks
    attn = jnp.einsum('bnd,bde->bne', q3, kv, preferred_element_type=jnp.float32)
    attn = attn.reshape(n_batch * hw, c)

    ret = attn + x                                  # first residual (f32)

    # MLP: proj2(GELU(proj1(ret))) + x  (Dropout p=0.0 is identity)
    h1 = jnp.dot(ret.astype(jnp.bfloat16), w12[:, 0:c],
                 preferred_element_type=jnp.float32) + b1
    if approx_gelu:
        h1 = jax.nn.gelu(h1, approximate=True)      # tanh on EUP (numerics tradeoff)
    else:
        h1 = _gelu_exact(h1)                        # strict nn.GELU() parity
    h2 = jnp.dot(h1.astype(jnp.bfloat16), w12[:, c:2 * c],
                 preferred_element_type=jnp.float32) + b2
    # TODO(synk): output stays (rows, C=32) -> 32-lane masked stores; a lane-dense
    # (rows*C/128, 128) slab needs the row-packing relayout noted above.
    o_ref[...] = (h2 + x).astype(o_ref.dtype)


def prepare_qkv_attn_params(params, heads, mm_dtype=jnp.bfloat16):
    """One-time (parameter-load-time) re-layout; NOT executed per forward call."""
    wqkv, bqkv, kg, kb, vg, vb, w1, b1, w2, b2 = params
    three_c, c = wqkv.shape
    headc = c // heads

    # Permute qkv_proj output channels from per-head-interleaved [q0 k0 v0 | q1 k1 v1..]
    # to QKV-contiguous head-major [Q_all | K_all | V_all]; pre-transpose all weights.
    perm = np.arange(3 * c).reshape(heads, 3, headc).transpose(1, 0, 2).reshape(-1)
    wqkv_t = jnp.transpose(wqkv[perm, :]).astype(mm_dtype)                 # (c, 3c)
    w12 = jnp.concatenate([jnp.transpose(w1), jnp.transpose(w2)],
                          axis=1).astype(mm_dtype)                         # (c, 2c)

    def pad3c(v):                                                          # (1,c)->(1,3c)
        return jnp.concatenate([v, jnp.zeros((1, 2 * c), v.dtype)], axis=1)

    vecs = jnp.concatenate([
        bqkv[:, perm],
        pad3c(jnp.tile(kg, (1, heads))), pad3c(jnp.tile(kb, (1, heads))),
        pad3c(jnp.tile(vg, (1, heads))), pad3c(jnp.tile(vb, (1, heads))),
        pad3c(b1), pad3c(b2),
        jnp.zeros((1, 3 * c), jnp.float32),
    ], axis=0).astype(jnp.float32)                                         # (8, 3c)

    # Block-diagonal 0/1 head mask: doubles as the segmented-reduction matrix.
    mask = jnp.asarray(np.kron(np.eye(heads, dtype=np.float32),
                               np.ones((headc, headc), dtype=np.float32))
                       ).astype(mm_dtype)                                  # (c, c)
    return wqkv_t, w12, vecs, mask


def _vmem_estimate_bytes(rows, c):
    # ~live f32 intermediates: (rows,3c) qkv + ~12 copies of (rows,c), plus
    # double-buffered in/out x blocks.
    return rows * c * 4 * (3 + 12) + 4 * rows * c * 4


def _pick_batch_tile(B, HW, C):
    try:
        kind = jax.devices()[0].device_kind.lower()
    except Exception:
        kind = ""
    two_tc = "7" in kind  # v7x: 2 TensorCores/chip -> shard the parallel grid axis
    budget = (24 << 20) if two_tc else (64 << 20)   # v7x VMEM is 64 MiB vs 128 MiB
    bt = B // 2 if (two_tc and B % 2 == 0) else B
    while bt > 1 and bt % 2 == 0 and _vmem_estimate_bytes(bt * HW, C) > budget:
        bt //= 2
    return bt


def qkv_attn_forward(x, prepared, heads, *, batch_tile=None, donate_x=False,
                     approx_gelu=False):
    wqkv_t, w12, vecs, mask = prepared
    B, HW, C = x.shape
    headc = C // heads

    bt = _pick_batch_tile(B, HW, C) if batch_tile is None else batch_tile
    assert B % bt == 0
    rows = bt * HW

    x2 = x.reshape(B * HW, C)                       # flatten batch into the row (M) dim
    kernel = functools.partial(qkv_attn_kernel, n_batch=bt, hw=HW, c=C,
                               headc=headc, approx_gelu=approx_gelu)

    def fullspec(arr):
        zeros = (0,) * arr.ndim
        return pl.BlockSpec(arr.shape, lambda i: zeros)

    cp_kwargs = dict(dimension_semantics=("parallel",))
    vmem_need = _vmem_estimate_bytes(rows, C)
    if vmem_need > (24 << 20):
        cp_kwargs["vmem_limit_bytes"] = int(min(2 * vmem_need, 100 << 20))

    out2 = pl.pallas_call(
        kernel,
        out_shape=jax.ShapeDtypeStruct((B * HW, C), x.dtype),
        grid=(B // bt,),
        in_specs=[
            pl.BlockSpec((rows, C), lambda i: (i, 0)),
            fullspec(wqkv_t), fullspec(w12), fullspec(vecs), fullspec(mask),
        ],
        out_specs=pl.BlockSpec((rows, C), lambda i: (i, 0)),
        compiler_params=pltpu.CompilerParams(**cp_kwargs),
        input_output_aliases=({0: 0} if donate_x else {}),
    )(x2, wqkv_t, w12, vecs, mask)
    return out2.reshape(B, HW, C)


def reference(x, params, heads):
    # Pure-JAX f32 mirror of the PyTorch forward (original parameter layout).
    wqkv, bqkv, kg, kb, vg, vb, w1, b1, w2, b2 = params
    B, HW, C = x.shape
    headc = C // heads
    qkv = x @ wqkv.T + bqkv[0]
    qkv = qkv.reshape(B, HW, heads, 3 * headc).transpose(0, 2, 1, 3)
    q, k, v = jnp.split(qkv, 3, axis=-1)

    def ln(t, g, b):
        mu = t.mean(-1, keepdims=True)
        var = ((t - mu) ** 2).mean(-1, keepdims=True)
        return (t - mu) / jnp.sqrt(var + 1e-5) * g[0] + b[0]

    k = ln(k, kg, kb)
    v = ln(v, vg, vb)
    kv = jnp.einsum('bhnd,bhne->bhde', k, v) / HW
    out = jnp.einsum('bhnd,bhde->bhne', q, kv)
    out = out.transpose(0, 2, 1, 3).reshape(B, HW, C)
    ret = out + x
    h1 = ret @ w1.T + b1[0]
    h1 = 0.5 * h1 * (1.0 + jax.lax.erf(h1 / jnp.sqrt(2.0)))
    h2 = h1 @ w2.T + b2[0]
    return h2 + x


if __name__ == "__main__":
    # Small shapes consistent with the module: midc=32, heads=4 (headc=8), tokens HW=64.
    B, HW, midc, heads = 2, 64, 32, 4
    headc = midc // heads

    key = jax.random.PRNGKey(0)
    ks = jax.random.split(key, 12)

    x = jax.random.normal(ks[0], (B, HW, midc), jnp.float32)

    # Deterministic synthetic parameters (shapes from qkv_attn.__init__).
    wqkv = 0.1 * jax.random.normal(ks[1], (3 * midc, midc), jnp.float32)
    bqkv = 0.1 * jax.random.normal(ks[2], (1, 3 * midc), jnp.float32)
    kg = 1.0 + 0.1 * jax.random.normal(ks[3], (1, headc), jnp.float32)
    kb = 0.1 * jax.random.normal(ks[4], (1, headc), jnp.float32)
    vg = 1.0 + 0.1 * jax.random.normal(ks[5], (1, headc), jnp.float32)
    vb = 0.1 * jax.random.normal(ks[6], (1, headc), jnp.float32)
    w1 = 0.1 * jax.random.normal(ks[7], (midc, midc), jnp.float32)
    b1 = 0.1 * jax.random.normal(ks[8], (1, midc), jnp.float32)
    w2 = 0.1 * jax.random.normal(ks[9], (midc, midc), jnp.float32)
    b2 = 0.1 * jax.random.normal(ks[10], (1, midc), jnp.float32)

    params = (wqkv, bqkv, kg, kb, vg, vb, w1, b1, w2, b2)

    # One-time weight re-layout (load-time), then the lean forward path.
    prepared = prepare_qkv_attn_params(params, heads)
    out = qkv_attn_forward(x, prepared, heads)
    out = jax.block_until_ready(out)

    ref = jax.block_until_ready(reference(x, params, heads))
    # atol relaxed 5e-3 -> 2e-2 to absorb bf16 MXU operands (per perf review); a real
    # semantic bug (wrong mask / residual / LN) produces errors >> this tolerance.
    np.testing.assert_allclose(np.asarray(out), np.asarray(ref), rtol=5e-2, atol=2e-2)

    print("KERNEL_OK")
</pallas_src>

<mosaic_0001>
module attributes {stable_mosaic.version = 11 : i64} {
  func.func @qkv_attn_kernel(%arg0: i32, %arg1: memref<128x32xf32, #tpu.memory_space<vmem>>, %arg2: memref<32x96xbf16, #tpu.memory_space<vmem>>, %arg3: memref<32x64xbf16, #tpu.memory_space<vmem>>, %arg4: memref<8x96xf32, #tpu.memory_space<vmem>>, %arg5: memref<32x32xbf16, #tpu.memory_space<vmem>>, %arg6: memref<128x32xf32, #tpu.memory_space<vmem>>) attributes {dimension_semantics = [#tpu.dimension_semantics<parallel>], iteration_bounds = array<i64: 1>, scalar_prefetch = 0 : i64, scratch_operands = 0 : i64, tpu.core_type = #tpu.core_type<tc>, window_params = [{transform_indices = @transform_0, window_bounds = array<i64: 128, 32>}, {pipeline_mode = #tpu.pipeline_mode<synchronous>, transform_indices = @transform_1, window_bounds = array<i64: 32, 96>}, {pipeline_mode = #tpu.pipeline_mode<synchronous>, transform_indices = @transform_2, window_bounds = array<i64: 32, 64>}, {pipeline_mode = #tpu.pipeline_mode<synchronous>, transform_indices = @transform_3, window_bounds = array<i64: 8, 96>}, {pipeline_mode = #tpu.pipeline_mode<synchronous>, transform_indices = @transform_4, window_bounds = array<i64: 32, 32>}, {transform_indices = @transform_5, window_bounds = array<i64: 128, 32>}]} {
    %c0 = arith.constant 0 : index
    %c0_0 = arith.constant 0 : index
    %0 = vector.load %arg1[%c0, %c0_0] : memref<128x32xf32, #tpu.memory_space<vmem>>, vector<128x32xf32>
    %c0_1 = arith.constant 0 : index
    %c0_2 = arith.constant 0 : index
    %1 = vector.load %arg2[%c0_1, %c0_2] : memref<32x96xbf16, #tpu.memory_space<vmem>>, vector<32x96xbf16>
    %c0_3 = arith.constant 0 : index
    %c0_4 = arith.constant 0 : index
    %2 = vector.load %arg3[%c0_3, %c0_4] : memref<32x64xbf16, #tpu.memory_space<vmem>>, vector<32x64xbf16>
    %c0_5 = arith.constant 0 : index
    %c0_6 = arith.constant 0 : index
    %3 = vector.load %arg4[%c0_5, %c0_6] : memref<8x96xf32, #tpu.memory_space<vmem>>, vector<8x96xf32>
    %c0_7 = arith.constant 0 : index
    %c0_8 = arith.constant 0 : index
    %4 = vector.load %arg5[%c0_7, %c0_8] : memref<32x32xbf16, #tpu.memory_space<vmem>>, vector<32x32xbf16>
    %5 = arith.extf %4 : vector<32x32xbf16> to vector<32x32xf32>
    %6 = vector.extract_strided_slice %3 {offsets = [0, 0], sizes = [1, 96], strides = [1, 1]} : vector<8x96xf32> to vector<1x96xf32>
    %7 = vector.extract_strided_slice %3 {offsets = [1, 0], sizes = [1, 32], strides = [1, 1]} : vector<8x96xf32> to vector<1x32xf32>
    %8 = vector.extract_strided_slice %3 {offsets = [2, 0], sizes = [1, 32], strides = [1, 1]} : vector<8x96xf32> to vector<1x32xf32>
    %9 = vector.extract_strided_slice %3 {offsets = [3, 0], sizes = [1, 32], strides = [1, 1]} : vector<8x96xf32> to vector<1x32xf32>
    %10 = vector.extract_strided_slice %3 {offsets = [4, 0], sizes = [1, 32], strides = [1, 1]} : vector<8x96xf32> to vector<1x32xf32>
    %11 = vector.extract_strided_slice %3 {offsets = [5, 0], sizes = [1, 32], strides = [1, 1]} : vector<8x96xf32> to vector<1x32xf32>
    %12 = vector.extract_strided_slice %3 {offsets = [6, 0], sizes = [1, 32], strides = [1, 1]} : vector<8x96xf32> to vector<1x32xf32>
    %13 = arith.truncf %0 : vector<128x32xf32> to vector<128x32xbf16>
    %cst = arith.constant dense<0.000000e+00> : vector<128x96xf32>
    %14 = tpu.matmul %13, %1, %cst {dimension_numbers = #tpu.dot_dimension_numbers<[1], [0], [0], [1], [0, 0, 1, 1], [], []>} : vector<128x32xbf16>, vector<32x96xbf16>, vector<128x96xf32> -> vector<128x96xf32>
    %15 = vector.broadcast %6 : vector<1x96xf32> to vector<128x96xf32>
    %16 = arith.addf %14, %15 : vector<128x96xf32>
    %17 = vector.extract_strided_slice %16 {offsets = [0, 0], sizes = [128, 32], strides = [1, 1]} : vector<128x96xf32> to vector<128x32xf32>
    %18 = vector.extract_strided_slice %16 {offsets = [0, 32], sizes = [128, 32], strides = [1, 1]} : vector<128x96xf32> to vector<128x32xf32>
    %19 = vector.extract_strided_slice %16 {offsets = [0, 64], sizes = [128, 32], strides = [1, 1]} : vector<128x96xf32> to vector<128x32xf32>
    %20 = arith.truncf %18 : vector<128x32xf32> to vector<128x32xbf16>
    %cst_9 = arith.constant dense<0.000000e+00> : vector<128x32xf32>
    %21 = tpu.matmul %20, %4, %cst_9 {dimension_numbers = #tpu.dot_dimension_numbers<[1], [0], [0], [1], [0, 0, 1, 1], [], []>} : vector<128x32xbf16>, vector<32x32xbf16>, vector<128x32xf32> -> vector<128x32xf32>
    %cst_10 = arith.constant 1.250000e-01 : f32
    %22 = vector.broadcast %cst_10 : f32 to vector<128x32xf32>
    %23 = arith.mulf %21, %22 : vector<128x32xf32>
    %24 = arith.subf %18, %23 : vector<128x32xf32>
    %25 = arith.mulf %24, %24 : vector<128x32xf32>
    %26 = arith.truncf %25 : vector<128x32xf32> to vector<128x32xbf16>
    %cst_11 = arith.constant dense<0.000000e+00> : vector<128x32xf32>
    %27 = tpu.matmul %26, %4, %cst_11 {dimension_numbers = #tpu.dot_dimension_numbers<[1], [0], [0], [1], [0, 0, 1, 1], [], []>} : vector<128x32xbf16>, vector<32x32xbf16>, vector<128x32xf32> -> vector<128x32xf32>
    %cst_12 = arith.constant 1.250000e-01 : f32
    %28 = vector.broadcast %cst_12 : f32 to vector<128x32xf32>
    %29 = arith.mulf %27, %28 : vector<128x32xf32>
    %cst_13 = arith.constant 9.99999974E-6 : f32
    %30 = vector.broadcast %cst_13 : f32 to vector<128x32xf32>
    %31 = arith.addf %29, %30 : vector<128x32xf32>
    %32 = math.rsqrt %31 : vector<128x32xf32>
    %33 = arith.mulf %24, %32 : vector<128x32xf32>
    %34 = vector.broadcast %7 : vector<1x32xf32> to vector<128x32xf32>
    %35 = arith.mulf %33, %34 : vector<128x32xf32>
    %36 = vector.broadcast %8 : vector<1x32xf32> to vector<128x32xf32>
    %37 = arith.addf %35, %36 : vector<128x32xf32>
    %38 = arith.truncf %19 : vector<128x32xf32> to vector<128x32xbf16>
    %cst_14 = arith.constant dense<0.000000e+00> : vector<128x32xf32>
    %39 = tpu.matmul %38, %4, %cst_14 {dimension_numbers = #tpu.dot_dimension_numbers<[1], [0], [0], [1], [0, 0, 1, 1], [], []>} : vector<128x32xbf16>, vector<32x32xbf16>, vector<128x32xf32> -> vector<128x32xf32>
    %cst_15 = arith.constant 1.250000e-01 : f32
    %40 = vector.broadcast %cst_15 : f32 to vector<128x32xf32>
    %41 = arith.mulf %39, %40 : vector<128x32xf32>
    %42 = arith.subf %19, %41 : vector<128x32xf32>
    %43 = arith.mulf %42, %42 : vector<128x32xf32>
    %44 = arith.truncf %43 : vector<128x32xf32> to vector<128x32xbf16>
    %cst_16 = arith.constant dense<0.000000e+00> : vector<128x32xf32>
    %45 = tpu.matmul %44, %4, %cst_16 {dimension_numbers = #tpu.dot_dimension_numbers<[1], [0], [0], [1], [0, 0, 1, 1], [], []>} : vector<128x32xbf16>, vector<32x32xbf16>, vector<128x32xf32> -> vector<128x32xf32>
    %cst_17 = arith.constant 1.250000e-01 : f32
    %46 = vector.broadcast %cst_17 : f32 to vector<128x32xf32>
    %47 = arith.mulf %45, %46 : vector<128x32xf32>
    %cst_18 = arith.constant 9.99999974E-6 : f32
    %48 = vector.broadcast %cst_18 : f32 to vector<128x32xf32>
    %49 = arith.addf %47, %48 : vector<128x32xf32>
    %50 = math.rsqrt %49 : vector<128x32xf32>
    %51 = arith.mulf %42, %50 : vector<128x32xf32>
    %52 = vector.broadcast %9 : vector<1x32xf32> to vector<128x32xf32>
    %53 = arith.mulf %51, %52 : vector<128x32xf32>
    %54 = vector.broadcast %10 : vector<1x32xf32> to vector<128x32xf32>
    %55 = arith.addf %53, %54 : vector<128x32xf32>
    %56 = arith.truncf %17 : vector<128x32xf32> to vector<128x32xbf16>
    %57 = vector.shape_cast %56 : vector<128x32xbf16> to vector<2x64x32xbf16>
    %58 = arith.truncf %37 : vector<128x32xf32> to vector<128x32xbf16>
    %59 = vector.shape_cast %58 : vector<128x32xbf16> to vector<2x64x32xbf16>
    %60 = arith.truncf %55 : vector<128x32xf32> to vector<128x32xbf16>
    %61 = vector.shape_cast %60 : vector<128x32xbf16> to vector<2x64x32xbf16>
    "tpu.trace_start"() <{level = 10 : i32, message = "bnd,bne->bde"}> : () -> ()
    %cst_19 = arith.constant dense<0.000000e+00> : vector<2x32x32xf32>
    %62 = tpu.matmul %59, %61, %cst_19 {dimension_numbers = #tpu.dot_dimension_numbers<[1], [1], [2], [2], [0, 0, 0, 2, 1, 2], [0], [0]>} : vector<2x64x32xbf16>, vector<2x64x32xbf16>, vector<2x32x32xf32> -> vector<2x32x32xf32>
    "tpu.trace_stop"() : () -> ()
    %63 = vector.shape_cast %5 : vector<32x32xf32> to vector<1x32x32xf32>
    %64 = vector.broadcast %63 : vector<1x32x32xf32> to vector<2x32x32xf32>
    %65 = arith.mulf %62, %64 : vector<2x32x32xf32>
    %cst_20 = arith.constant 1.562500e-02 : f32
    %66 = vector.broadcast %cst_20 : f32 to vector<2x32x32xf32>
    %67 = arith.mulf %65, %66 : vector<2x32x32xf32>
    %68 = arith.truncf %67 : vector<2x32x32xf32> to vector<2x32x32xbf16>
    "tpu.trace_start"() <{level = 10 : i32, message = "bnd,bde->bne"}> : () -> ()
    %cst_21 = arith.constant dense<0.000000e+00> : vector<2x64x32xf32>
    %69 = tpu.matmul %57, %68, %cst_21 {dimension_numbers = #tpu.dot_dimension_numbers<[2], [1], [1], [2], [0, 0, 0, 1, 1, 2], [0], [0]>} : vector<2x64x32xbf16>, vector<2x32x32xbf16>, vector<2x64x32xf32> -> vector<2x64x32xf32>
    "tpu.trace_stop"() : () -> ()
    %70 = vector.shape_cast %69 : vector<2x64x32xf32> to vector<128x32xf32>
    %71 = arith.addf %70, %0 : vector<128x32xf32>
    %72 = arith.truncf %71 : vector<128x32xf32> to vector<128x32xbf16>
    %73 = vector.extract_strided_slice %2 {offsets = [0, 0], sizes = [32, 32], strides = [1, 1]} : vector<32x64xbf16> to vector<32x32xbf16>
    %cst_22 = arith.constant dense<0.000000e+00> : vector<128x32xf32>
    %74 = tpu.matmul %72, %73, %cst_22 {dimension_numbers = #tpu.dot_dimension_numbers<[1], [0], [0], [1], [0, 0, 1, 1], [], []>} : vector<128x32xbf16>, vector<32x32xbf16>, vector<128x32xf32> -> vector<128x32xf32>
    %75 = vector.broadcast %11 : vector<1x32xf32> to vector<128x32xf32>
    %76 = arith.addf %74, %75 : vector<128x32xf32>
    %cst_23 = arith.constant 5.000000e-01 : f32
    %77 = vector.broadcast %cst_23 : f32 to vector<128x32xf32>
    %78 = arith.mulf %77, %76 : vector<128x32xf32>
    %cst_24 = arith.constant 0.707106769 : f32
    %79 = vector.broadcast %cst_24 : f32 to vector<128x32xf32>
    %80 = arith.mulf %76, %79 : vector<128x32xf32>
    %81 = math.erf %80 : vector<128x32xf32>
    %cst_25 = arith.constant 1.000000e+00 : f32
    %82 = vector.broadcast %cst_25 : f32 to vector<128x32xf32>
    %83 = arith.addf %82, %81 : vector<128x32xf32>
    %84 = arith.mulf %78, %83 : vector<128x32xf32>
    %85 = arith.truncf %84 : vector<128x32xf32> to vector<128x32xbf16>
    %86 = vector.extract_strided_slice %2 {offsets = [0, 32], sizes = [32, 32], strides = [1, 1]} : vector<32x64xbf16> to vector<32x32xbf16>
    %cst_26 = arith.constant dense<0.000000e+00> : vector<128x32xf32>
    %87 = tpu.matmul %85, %86, %cst_26 {dimension_numbers = #tpu.dot_dimension_numbers<[1], [0], [0], [1], [0, 0, 1, 1], [], []>} : vector<128x32xbf16>, vector<32x32xbf16>, vector<128x32xf32> -> vector<128x32xf32>
    %88 = vector.broadcast %12 : vector<1x32xf32> to vector<128x32xf32>
    %89 = arith.addf %87, %88 : vector<128x32xf32>
    %90 = arith.addf %89, %0 : vector<128x32xf32>
    %c0_27 = arith.constant 0 : index
    %c0_28 = arith.constant 0 : index
    %91 = vector.load %arg6[%c0_27, %c0_28] : memref<128x32xf32, #tpu.memory_space<vmem>>, vector<128x32xf32>
    tpu.vector_store %arg6[%c0_27, %c0_28], %90 {strides = array<i32>} : memref<128x32xf32, #tpu.memory_space<vmem>>, vector<128x32xf32>,
    return
  }
  func.func @transform_0(%arg0: i32) -> (i32, i32) {
    %c0_i32 = arith.constant 0 : i32
    %c0_i32_0 = arith.constant 0 : i32
    return %arg0, %c0_i32 : i32, i32
  }
  func.func @transform_1(%arg0: i32) -> (i32, i32) {
    %c0_i32 = arith.constant 0 : i32
    %c0_i32_0 = arith.constant 0 : i32
    %c0_i32_1 = arith.constant 0 : i32
    return %c0_i32, %c0_i32_0 : i32, i32
  }
  func.func @transform_2(%arg0: i32) -> (i32, i32) {
    %c0_i32 = arith.constant 0 : i32
    %c0_i32_0 = arith.constant 0 : i32
    %c0_i32_1 = arith.constant 0 : i32
    return %c0_i32, %c0_i32_0 : i32, i32
  }
  func.func @transform_3(%arg0: i32) -> (i32, i32) {
    %c0_i32 = arith.constant 0 : i32
    %c0_i32_0 = arith.constant 0 : i32
    %c0_i32_1 = arith.constant 0 : i32
    return %c0_i32, %c0_i32_0 : i32, i32
  }
  func.func @transform_4(%arg0: i32) -> (i32, i32) {
    %c0_i32 = arith.constant 0 : i32
    %c0_i32_0 = arith.constant 0 : i32
    %c0_i32_1 = arith.constant 0 : i32
    return %c0_i32, %c0_i32_0 : i32, i32
  }
  func.func @transform_5(%arg0: i32) -> (i32, i32) {
    %c0_i32 = arith.constant 0 : i32
    %c0_i32_0 = arith.constant 0 : i32
    return %arg0, %c0_i32 : i32, i32
  }
}

</mosaic_0001>

<bundles_post_ra>
// kernel: tpu_custom_call.1
= control target key start
LH: loop header
LB: loop body
LE: loop exit
PB: predicated region body
PF: predicated region fallthrough
CT: control target
= control target key end

     0   :  { %vm78_vm0 = vcmask 261120   ;;  %v62_v27 = vlaneseq  ;;  %s2680_s8 = smov 96   ;;  %s2681_s9 = smov 64   ;;  %vm1448_vm1 = vcmask 523264   ;;  %s3575_s1 = inlined_call_operand.vmem [shape: bf16[32,96], index: 1, kind: input, shape index: {}]   ;;  %s3576_s0 = inlined_call_operand.vmem [shape: f32[128,32], index: 0, kind: input, shape index: {}]   ;;  %s3577_s4 = inlined_call_operand.vmem [shape: bf16[32,32], index: 4, kind: input, shape index: {}]   ;;  %s3578_s3 = inlined_call_operand.vmem [shape: f32[8,96], index: 3, kind: input, shape index: {}]   ;;  %s3579_s2 = inlined_call_operand.vmem [shape: bf16[32,64], index: 2, kind: input, shape index: {}]   ;;  %s3580_s5 = inlined_call_operand.vmem [shape: f32[128,32], index: 5, kind: output, shape index: {}]  }
   0x1   :  { %v2557_v0 = vld [vmem:[%s3575_s1] sm:$0xff]   ;;  %v2558_v1 = vld [vmem:[%s3575_s1 + $0x8] sm:$0xff]   ;;  %v23_v5 = vld [vmem:[%s3576_s0 + $0x10] sm:$0xff]  ;;  %s2682_s10 = smov 32  }
   0x2   :  { %2365 = vmatprep.subr.bf16.mxu0 %v2557_v0  ;;  %v21_v2 = vld [vmem:[%s3576_s0] sm:$0xff]  ;;  %v22_v3 = vld [vmem:[%s3576_s0 + $0x8] sm:$0xff]  ;;  %v24_v6 = vld [vmem:[%s3576_s0 + $0x18] sm:$0xff]  ;;  %v2784_v28 = vshrl.u32 %v62_v27, 7 }
   0x3   :  { %2366 = vmatpush3.bf16.msra.mxu0 %v2557_v0  ;;  %v54_v4 = vpack.c.bf16 %v22_v3, %v21_v2  ;;  %v25_v7 = vld [vmem:[%s3576_s0 + $0x20] sm:$0xff]  ;;  %v26_v8 = vld [vmem:[%s3576_s0 + $0x28] sm:$0xff]  ;;  %v55_v9 = vpack.c.bf16 %v24_v6, %v23_v5  ;;  %v27_v11 = vld [vmem:[%s3576_s0 + $0x30] sm:$0xff] }
   0x4   :  { %2367 = vmatprep.subr.bf16.mxu0 %v2558_v1  ;;  %v56_v10 = vpack.c.bf16 %v26_v8, %v25_v7  ;;  %v28_v12 = vld [vmem:[%s3576_s0 + $0x38] sm:$0xff]  ;;  %v29_v13 = vld [vmem:[%s3576_s0 + $0x40] sm:$0xff]  ;;  %v30_v14 = vld [vmem:[%s3576_s0 + $0x48] sm:$0xff]  ;;  %v64_v30 = vsub.s32 0, %v2784_v28 }
   0x5   :  { %2369 = vmatprep.mubr.msk.bf16.mxu0 %vm78_vm0, %v54_v4  ;;  %v57_v15 = vpack.c.bf16 %v28_v12, %v27_v11  ;;  %v58_v16 = vpack.c.bf16 %v30_v14, %v29_v13  ;;  %v31_v17 = vld [vmem:[%s3576_s0 + $0x50] sm:$0xff]  ;;  %v32_v18 = vld [vmem:[%s3576_s0 + $0x58] sm:$0xff]  ;;  %v33_v19 = vld [vmem:[%s3576_s0 + $0x60] sm:$0xff] }
   0x6   :  { %v34_v20 = vld [vmem:[%s3576_s0 + $0x68] sm:$0xff]  ;;  %v59_v21 = vpack.c.bf16 %v32_v18, %v31_v17  ;;  %v35_v23 = vld [vmem:[%s3576_s0 + $0x70] sm:$0xff]  ;;  %v36_v24 = vld [vmem:[%s3576_s0 + $0x78] sm:$0xff] }
   0x7   :  { %2368 = vmatpush3.bf16.msra.mxu0 %v2558_v1  ;;  %v60_v22 = vpack.c.bf16 %v34_v20, %v33_v19  ;;  %v61_v25 = vpack.c.bf16 %v36_v24, %v35_v23  ;;  %v2778_v26 = vld [vmem:[%s3577_s4] sm:$0xff]   ;;  %v2789_v29 = vld [vmem:[%s3577_s4 + $0x8] sm:$0xff]  }
   0x8   :  { %2385 = vmatprep.subr.bf16.mxu1 %v2778_v26  ;;  %2405 = vmatprep.subr.bf16.mxu0 %v2778_v26  ;;  %v2799_v31 = vld [vmem:[%s3578_s3] sm:$0xff] }
   0x9   :  { %2386 = vmatpush3.bf16.msra.mxu1 %v2778_v26  ;;  %v65_v32 = vrot.slane %v2799_v31, %v64_v30 }
   0xa   :  { %2370 = vmatmul.mubr.msk.bf16.vlgmr.msra.gmra.mrb[0].mxu0 %vm78_vm0, %v55_v9  ;;  %2387 = vmatprep.subr.bf16.mxu1 %v2789_v29 }
   0xb   :  { %2373 = vmatprep.mubr.msk.bf16.mxu0 %vm78_vm0, %v56_v10  ;;  %2406 = vmatpush3.bf16.msra.mxu0 %v2778_v26 }
   0xc   :  { %2407 = vmatprep.subr.bf16.mxu0 %v2789_v29 }
   0xd   :  { %2388 = vmatpush3.bf16.msra.mxu1 %v2789_v29 }
   0xe   :  { %2425 = vmatprep.subr.bf16.mxu1 %v2778_v26 }
   0xf   :  { %2408 = vmatpush3.bf16.msra.mxu0 %v2789_v29 }
  0x10   :  { %2445 = vmatprep.subr.bf16.mxu0 %v2778_v26 }
  0x12   :  { %2374 = vmatmul.mubr.msk.bf16.gmra.mrb[4].mxu0 %vm78_vm0, %v57_v15 }
  0x13   :  { %2377 = vmatprep.mubr.msk.bf16.mxu0 %vm78_vm0, %v58_v16 }
  0x1a   :  { %2378 = vmatmul.mubr.msk.bf16.gmra.mrb[8].mxu0 %vm78_vm0, %v59_v21 }
  0x1b   :  { %2381 = vmatprep.mubr.msk.bf16.mxu0 %vm78_vm0, %v60_v22 }
  0x22   :  { %2382 = vmatmul.mubr.msk.bf16.gmra.mrb[12].mxu0 %vm78_vm0, %v61_v25 }
  0xdd   :  { %v2371_v33 = vpop.f32.mrb[0].mxu0 }
  0xde   :  { %v137_v34 = vpop.f32.mrb[1].mxu0  ;;  %v2814_v41 = vadd.f32 %v2371_v33, %v65_v32 }
  0xdf   :  { %v2372_v35 = vpop.f32.mrb[2].mxu0  ;;  %v2804_v37 = vadd.f32 %v137_v34, %v65_v32 }
  0xe0   :  { %v140_v36 = vpop.f32.mrb[3].mxu0  ;;  %v2808_v39 = vadd.f32 %v2372_v35, %v65_v32 }
  0xe1   :  { %v2806_v38 = vadd.f32 %v140_v36, %v65_v32 }
  0xe2   :  { %v2820_v45 = vpack.c.bf16 %v2808_v39, %v2814_v41 }
  0xe3   :  { %v2812_v40 = vpack.c.bf16 %v2806_v38, %v2804_v37 }
  0xe5   :  { %v2375_v42 = vpop.f32.mrb[4].mxu0  ;;  %216 = vrot.lane.b32.xlu0 %v2812_v40, %s2680_s8 }
  0xe6   :  { %v153_v43 = vpop.f32.mrb[5].mxu0  ;;  %v2834_v51 = vadd.f32 %v2375_v42, %v65_v32 }
  0xe7   :  { %v2376_v44 = vpop.f32.mrb[6].mxu0  ;;  %v2822_v47 = vadd.f32 %v153_v43, %v65_v32 }
  0xe8   :  { %v156_v46 = vpop.f32.mrb[7].mxu0  ;;  %v2828_v49 = vadd.f32 %v2376_v44, %v65_v32 }
  0xe9   :  { %v2824_v48 = vadd.f32 %v156_v46, %v65_v32  ;;  %218 = vrot.lane.b32.xlu0 %v2820_v45, %s2680_s8 }
  0xea   :  { %v2844_v57 = vpack.c.bf16 %v2828_v49, %v2834_v51 }
  0xeb   :  { %v2832_v50 = vpack.c.bf16 %v2824_v48, %v2822_v47 }
  0xed   :  { %v2379_v52 = vpop.f32.mrb[8].mxu0  ;;  %220 = vrot.lane.b32.xlu1 %v2832_v50, %s2680_s8 }
  0xee   :  { %v2838_v53 = vadd.f32 %v2379_v52, %v65_v32  ;;  %v169_v54 = vpop.f32.mrb[9].mxu0 }
  0xef   :  { %v2840_v55 = vadd.f32 %v169_v54, %v65_v32  ;;  %v2380_v56 = vpop.f32.mrb[10].mxu0 }
  0xf0   :  { %v2846_v58 = vadd.f32 %v2380_v56, %v65_v32  ;;  %v172_v59 = vpop.f32.mrb[11].mxu0 }
  0xf1   :  { %v2848_v60 = vadd.f32 %v172_v59, %v65_v32  ;;  %222 = vrot.lane.b32.xlu1 %v2844_v57, %s2680_s8 }
  0xf2   :  { %v2854_v61 = vpack.c.bf16 %v2846_v58, %v2838_v53 }
  0xf3   :  { %v2858_v62 = vpack.c.bf16 %v2848_v60, %v2840_v55 }
  0xf5   :  { %v2383_v63 = vpop.f32.mrb[12].mxu0  ;;  %226 = vrot.lane.b32.xlu1 %v2854_v61, %s2680_s8  ;;  %224 = vrot.lane.b32.xlu0 %v2858_v62, %s2680_s8 }
  0xf6   :  { %v2864_v0 = vadd.f32 %v2383_v63, %v65_v32  ;;  %v185_v1 = vpop.f32.mrb[13].mxu0 }
  0xf7   :  { %v2866_v2 = vadd.f32 %v185_v1, %v65_v32  ;;  %v2384_v3 = vpop.f32.mrb[14].mxu0 }
  0xf8   :  { %v2868_v4 = vadd.f32 %v2384_v3, %v65_v32  ;;  %v188_v5 = vpop.f32.mrb[15].mxu0 }
  0xf9   :  { %v2870_v6 = vadd.f32 %v188_v5, %v65_v32 }
  0xfa   :  { %v2874_v7 = vpack.c.bf16 %v2868_v4, %v2864_v0 }
  0xfb   :  { %v2878_v8 = vpack.c.bf16 %v2870_v6, %v2866_v2 }
  0xfc   :  { %230 = vrot.lane.b32.xlu1 %v2874_v7, %s2680_s8 }
  0xfd   :  { %228 = vrot.lane.b32.xlu0 %v2878_v8, %s2680_s8 }
 0x100   :  { %808 = vrot.lane.b32.xlu1 %v2820_v45, %s2681_s9 }
 0x101   :  { %806 = vrot.lane.b32.xlu0 %v2812_v40, %s2681_s9 }
 0x104   :  { %812 = vrot.lane.b32.xlu1 %v2844_v57, %s2681_s9 }
 0x105   :  { %810 = vrot.lane.b32.xlu0 %v2832_v50, %s2681_s9 }
 0x108   :  { %816 = vrot.lane.b32.xlu1 %v2854_v61, %s2681_s9 }
 0x109   :  { %814 = vrot.lane.b32.xlu0 %v2858_v62, %s2681_s9 }
 0x10c   :  { %820 = vrot.lane.b32.xlu1 %v2874_v7, %s2681_s9 }
 0x10d   :  { %818 = vrot.lane.b32.xlu0 %v2878_v8, %s2681_s9 }
 0x157   :  { %v217_v9 = vpop.permute.xlu0 %216 }
 0x158   :  { %2389 = vmatprep.mubr.msk.bf16.mxu1 %vm78_vm0, %v217_v9 }
 0x15b   :  { %v219_v10 = vpop.permute.xlu0 %218 }
 0x15c   :  { %2390 = vmatmul.mubr.msk.bf16.vlgmr.msra.gmra.mrb[0].mxu1 %vm78_vm0, %v219_v10 }
 0x15d   :  { %2426 = vmatpush3.bf16.msra.mxu1 %v2778_v26 }
 0x15e   :  { %2427 = vmatprep.subr.bf16.mxu1 %v2789_v29 }
 0x15f   :  { %v221_v11 = vpop.permute.xlu1 %220 }
 0x160   :  { %2393 = vmatprep.mubr.msk.bf16.mxu1 %vm78_vm0, %v221_v11 }
 0x161   :  { %2428 = vmatpush3.bf16.msra.mxu1 %v2789_v29 }
 0x163   :  { %v223_v12 = vpop.permute.xlu1 %222 }
 0x164   :  { %2394 = vmatmul.mubr.msk.bf16.gmra.mrb[4].mxu1 %vm78_vm0, %v223_v12 }
 0x167   :  { %v225_v13 = vpop.permute.xlu0 %224  ;;  %v227_v14 = vpop.permute.xlu1 %226 }
 0x168   :  { %2397 = vmatprep.mubr.msk.bf16.mxu1 %vm78_vm0, %v225_v13 }
 0x16c   :  { %2398 = vmatmul.mubr.msk.bf16.gmra.mrb[8].mxu1 %vm78_vm0, %v227_v14 }
 0x16e   :  { %v231_v16 = vpop.permute.xlu1 %230 }
 0x16f   :  { %v229_v15 = vpop.permute.xlu0 %228 }
 0x170   :  { %2401 = vmatprep.mubr.msk.bf16.mxu1 %vm78_vm0, %v229_v15 }
 0x172   :  { %v809_v18 = vpop.permute.xlu1 %808 }
 0x173   :  { %v807_v17 = vpop.permute.xlu0 %806 }
 0x174   :  { %2402 = vmatmul.mubr.msk.bf16.gmra.mrb[12].mxu1 %vm78_vm0, %v231_v16 }
 0x175   :  { %2429 = vmatprep.mubr.msk.bf16.mxu1 %vm78_vm0, %v807_v17 }
 0x176   :  { %v813_v20 = vpop.permute.xlu1 %812 }
 0x177   :  { %v811_v19 = vpop.permute.xlu0 %810 }
 0x17a   :  { %v817_v22 = vpop.permute.xlu1 %816 }
 0x17b   :  { %v815_v21 = vpop.permute.xlu0 %814 }
 0x17c   :  { %2430 = vmatmul.mubr.msk.bf16.vlgmr.msra.gmra.mrb[16].mxu1 %vm78_vm0, %v809_v18 }
 0x17d   :  { %2433 = vmatprep.mubr.msk.bf16.mxu1 %vm78_vm0, %v811_v19 }
 0x17e   :  { %v821_v24 = vpop.permute.xlu1 %820 }
 0x17f   :  { %v819_v23 = vpop.permute.xlu0 %818 }
 0x184   :  { %2434 = vmatmul.mubr.msk.bf16.gmra.mrb[20].mxu1 %vm78_vm0, %v813_v20 }
 0x185   :  { %2437 = vmatprep.mubr.msk.bf16.mxu1 %vm78_vm0, %v815_v21 }
 0x18c   :  { %2438 = vmatmul.mubr.msk.bf16.gmra.mrb[24].mxu1 %vm78_vm0, %v817_v22 }
 0x18d   :  { %2441 = vmatprep.mubr.msk.bf16.mxu1 %vm78_vm0, %v819_v23 }
 0x194   :  { %2442 = vmatmul.mubr.msk.bf16.gmra.mrb[28].mxu1 %vm78_vm0, %v821_v24 }
 0x22f   :  { %v2391_v25 = vpop.f32.mrb[0].mxu1 }
 0x230   :  { %v302_v27 = vpop.f32.mrb[1].mxu1  ;;  %v367_v35 = vmul.f32 0.125, %v2391_v25 }
 0x231   :  { %v365_v30 = vmul.f32 0.125, %v302_v27  ;;  %v2392_v32 = vpop.f32.mrb[2].mxu1 }
 0x232   :  { %v305_v33 = vpop.f32.mrb[3].mxu1  ;;  %v368_v36 = vmul.f32 0.125, %v2392_v32 }
 0x233   :  { %v366_v34 = vmul.f32 0.125, %v305_v33  ;;  %397 = vrot.lane.b32.xlu0 %v365_v30, %s2682_s10 }
 0x235   :  { %399 = vrot.lane.b32.xlu1 %v366_v34, %s2682_s10 }
 0x237   :  { %401 = vrot.lane.b32.xlu0 %v367_v35, %s2682_s10  ;;  %v2395_v42 = vpop.f32.mrb[4].mxu1 }
 0x238   :  { %v318_v43 = vpop.f32.mrb[5].mxu1  ;;  %v371_v56 = vmul.f32 0.125, %v2395_v42 }
 0x239   :  { %v369_v44 = vmul.f32 0.125, %v318_v43  ;;  %403 = vrot.lane.b32.xlu1 %v368_v36, %s2682_s10  ;;  %v2396_v46 = vpop.f32.mrb[6].mxu1 }
 0x23a   :  { %v321_v52 = vpop.f32.mrb[7].mxu1  ;;  %v372_v59 = vmul.f32 0.125, %v2396_v46 }
 0x23b   :  { %v370_v54 = vmul.f32 0.125, %v321_v52  ;;  %405 = vrot.lane.b32.xlu0 %v369_v44, %s2682_s10 }
 0x23d   :  { %407 = vrot.lane.b32.xlu1 %v370_v54, %s2682_s10 }
 0x23f   :  { %409 = vrot.lane.b32.xlu0 %v371_v56, %s2682_s10  ;;  %v2399_v63 = vpop.f32.mrb[8].mxu1 }
 0x240   :  { %v334_v1 = vpop.f32.mrb[9].mxu1  ;;  %v375_v11 = vmul.f32 0.125, %v2399_v63 }
 0x241   :  { %v373_v3 = vmul.f32 0.125, %v334_v1  ;;  %411 = vrot.lane.b32.xlu1 %v372_v59, %s2682_s10  ;;  %v2400_v5 = vpop.f32.mrb[10].mxu1 }
 0x242   :  { %v337_v9 = vpop.f32.mrb[11].mxu1  ;;  %v376_v12 = vmul.f32 0.125, %v2400_v5 }
 0x243   :  { %v374_v10 = vmul.f32 0.125, %v337_v9  ;;  %413 = vrot.lane.b32.xlu0 %v373_v3, %s2682_s10 }
 0x245   :  { %415 = vrot.lane.b32.xlu1 %v374_v10, %s2682_s10 }
 0x247   :  { %417 = vrot.lane.b32.xlu0 %v375_v11, %s2682_s10  ;;  %v2403_v13 = vpop.f32.mrb[12].mxu1 }
 0x248   :  { %v350_v14 = vpop.f32.mrb[13].mxu1  ;;  %v379_v19 = vmul.f32 0.125, %v2403_v13 }
 0x249   :  { %v377_v15 = vmul.f32 0.125, %v350_v14  ;;  %419 = vrot.lane.b32.xlu1 %v376_v12, %s2682_s10  ;;  %v2404_v16 = vpop.f32.mrb[14].mxu1 }
 0x24a   :  { %v353_v17 = vpop.f32.mrb[15].mxu1  ;;  %v380_v20 = vmul.f32 0.125, %v2404_v16 }
 0x24b   :  { %v378_v18 = vmul.f32 0.125, %v353_v17  ;;  %421 = vrot.lane.b32.xlu0 %v377_v15, %s2682_s10 }
 0x24d   :  { %423 = vrot.lane.b32.xlu1 %v378_v18, %s2682_s10 }
 0x24f   :  { %425 = vrot.lane.b32.xlu0 %v379_v19, %s2682_s10  ;;  %v2431_v21 = vpop.f32.mrb[16].mxu1 }
 0x250   :  { %v880_v22 = vpop.f32.mrb[17].mxu1  ;;  %v945_v30 = vmul.f32 0.125, %v2431_v21 }
 0x251   :  { %v943_v23 = vmul.f32 0.125, %v880_v22  ;;  %427 = vrot.lane.b32.xlu1 %v380_v20, %s2682_s10  ;;  %v2432_v24 = vpop.f32.mrb[18].mxu1 }
 0x252   :  { %v883_v25 = vpop.f32.mrb[19].mxu1  ;;  %v946_v32 = vmul.f32 0.125, %v2432_v24 }
 0x253   :  { %v944_v27 = vmul.f32 0.125, %v883_v25  ;;  %975 = vrot.lane.b32.xlu0 %v943_v23, %s2681_s9 }
 0x255   :  { %977 = vrot.lane.b32.xlu1 %v944_v27, %s2681_s9 }
 0x257   :  { %979 = vrot.lane.b32.xlu0 %v945_v30, %s2681_s9  ;;  %v2435_v33 = vpop.f32.mrb[20].mxu1 }
 0x258   :  { %v896_v34 = vpop.f32.mrb[21].mxu1  ;;  %v949_v44 = vmul.f32 0.125, %v2435_v33 }
 0x259   :  { %v947_v35 = vmul.f32 0.125, %v896_v34  ;;  %981 = vrot.lane.b32.xlu1 %v946_v32, %s2681_s9  ;;  %v2436_v36 = vpop.f32.mrb[22].mxu1 }
 0x25a   :  { %v899_v42 = vpop.f32.mrb[23].mxu1  ;;  %v950_v46 = vmul.f32 0.125, %v2436_v36 }
 0x25b   :  { %v948_v43 = vmul.f32 0.125, %v899_v42  ;;  %983 = vrot.lane.b32.xlu0 %v947_v35, %s2681_s9 }
 0x25d   :  { %985 = vrot.lane.b32.xlu1 %v948_v43, %s2681_s9 }
 0x25f   :  { %987 = vrot.lane.b32.xlu0 %v949_v44, %s2681_s9  ;;  %v2439_v52 = vpop.f32.mrb[24].mxu1 }
 0x260   :  { %v912_v54 = vpop.f32.mrb[25].mxu1  ;;  %v953_v3 = vmul.f32 0.125, %v2439_v52 }
 0x261   :  { %v951_v56 = vmul.f32 0.125, %v912_v54  ;;  %989 = vrot.lane.b32.xlu1 %v950_v46, %s2681_s9  ;;  %v2440_v59 = vpop.f32.mrb[26].mxu1 }
 0x262   :  { %v915_v63 = vpop.f32.mrb[27].mxu1  ;;  %v954_v5 = vmul.f32 0.125, %v2440_v59 }
 0x263   :  { %v952_v1 = vmul.f32 0.125, %v915_v63  ;;  %991 = vrot.lane.b32.xlu0 %v951_v56, %s2681_s9 }
 0x265   :  { %993 = vrot.lane.b32.xlu1 %v952_v1, %s2681_s9 }
 0x267   :  { %995 = vrot.lane.b32.xlu0 %v953_v3, %s2681_s9  ;;  %v2443_v9 = vpop.f32.mrb[28].mxu1 }
 0x268   :  { %v928_v10 = vpop.f32.mrb[29].mxu1  ;;  %v957_v15 = vmul.f32 0.125, %v2443_v9 }
 0x269   :  { %v955_v11 = vmul.f32 0.125, %v928_v10  ;;  %997 = vrot.lane.b32.xlu1 %v954_v5, %s2681_s9  ;;  %v2444_v12 = vpop.f32.mrb[30].mxu1 }
 0x26a   :  { %v931_v13 = vpop.f32.mrb[31].mxu1  ;;  %v958_v16 = vmul.f32 0.125, %v2444_v12 }
 0x26b   :  { %v956_v14 = vmul.f32 0.125, %v931_v13  ;;  %999 = vrot.lane.b32.xlu0 %v955_v11, %s2681_s9 }
 0x26d   :  { %1001 = vrot.lane.b32.xlu1 %v956_v14, %s2681_s9 }
 0x26f   :  { %1003 = vrot.lane.b32.xlu0 %v957_v15, %s2681_s9 }
 0x271   :  { %1005 = vrot.lane.b32.xlu1 %v958_v16, %s2681_s9 }
 0x2a5   :  { %v398_v17 = vpop.permute.xlu0 %397 }
 0x2a6   :  { %v2952_v18 = vsub.f32 %v2804_v37, %v398_v17 }
 0x2a7   :  { %v400_v19 = vpop.permute.xlu1 %399 }
 0x2a8   :  { %v2955_v20 = vsub.f32 %v2806_v38, %v400_v19  ;;  %v461_v22 = vmul.f32 %v2952_v18, %v2952_v18 }
 0x2a9   :  { %v402_v21 = vpop.permute.xlu0 %401 }
 0x2aa   :  { %v462_v23 = vmul.f32 %v2955_v20, %v2955_v20  ;;  %v2962_v24 = vsub.f32 %v2814_v41, %v402_v21 }
 0x2ab   :  { %v404_v25 = vpop.permute.xlu1 %403 }
 0x2ac   :  { %v2965_v27 = vsub.f32 %v2808_v39, %v404_v25  ;;  %v477_v30 = vpack.c.bf16 %v462_v23, %v461_v22  ;;  %v463_v33 = vmul.f32 %v2962_v24, %v2962_v24 }
 0x2ad   :  { %v406_v32 = vpop.permute.xlu0 %405 }
 0x2ae   :  { %v464_v34 = vmul.f32 %v2965_v27, %v2965_v27  ;;  %v2972_v35 = vsub.f32 %v2822_v47, %v406_v32  ;;  %493 = vrot.lane.b32.xlu0 %v477_v30, %s2680_s8 }
 0x2af   :  { %v408_v36 = vpop.permute.xlu1 %407 }
 0x2b0   :  { %v2976_v42 = vsub.f32 %v2824_v48, %v408_v36  ;;  %v478_v43 = vpack.c.bf16 %v464_v34, %v463_v33  ;;  %v465_v46 = vmul.f32 %v2972_v35, %v2972_v35 }
 0x2b1   :  { %v410_v44 = vpop.permute.xlu0 %409 }
 0x2b2   :  { %v466_v52 = vmul.f32 %v2976_v42, %v2976_v42  ;;  %v2983_v54 = vsub.f32 %v2834_v51, %v410_v44  ;;  %495 = vrot.lane.b32.xlu1 %v478_v43, %s2680_s8 }
 0x2b3   :  { %v412_v56 = vpop.permute.xlu1 %411 }
 0x2b4   :  { %v2987_v59 = vsub.f32 %v2828_v49, %v412_v56  ;;  %v479_v63 = vpack.c.bf16 %v466_v52, %v465_v46  ;;  %v467_v3 = vmul.f32 %v2983_v54, %v2983_v54 }
 0x2b5   :  { %v414_v1 = vpop.permute.xlu0 %413 }
 0x2b6   :  { %v468_v5 = vmul.f32 %v2987_v59, %v2987_v59  ;;  %v2994_v9 = vsub.f32 %v2840_v55, %v414_v1  ;;  %497 = vrot.lane.b32.xlu0 %v479_v63, %s2680_s8 }
 0x2b7   :  { %v416_v10 = vpop.permute.xlu1 %415 }
 0x2b8   :  { %v2998_v11 = vsub.f32 %v2848_v60, %v416_v10  ;;  %v480_v12 = vpack.c.bf16 %v468_v5, %v467_v3  ;;  %v469_v14 = vmul.f32 %v2994_v9, %v2994_v9 }
 0x2b9   :  { %v418_v13 = vpop.permute.xlu0 %417 }
 0x2ba   :  { %v470_v15 = vmul.f32 %v2998_v11, %v2998_v11  ;;  %v3005_v16 = vsub.f32 %v2838_v53, %v418_v13  ;;  %499 = vrot.lane.b32.xlu1 %v480_v12, %s2680_s8 }
 0x2bb   :  { %v420_v17 = vpop.permute.xlu1 %419 }
 0x2bc   :  { %v3009_v19 = vsub.f32 %v2846_v58, %v420_v17  ;;  %v481_v21 = vpack.c.bf16 %v470_v15, %v469_v14  ;;  %v471_v23 = vmul.f32 %v3005_v16, %v3005_v16 }
 0x2bd   :  { %v422_v22 = vpop.permute.xlu0 %421 }
 0x2be   :  { %v472_v25 = vmul.f32 %v3009_v19, %v3009_v19  ;;  %v3016_v30 = vsub.f32 %v2866_v2, %v422_v22  ;;  %501 = vrot.lane.b32.xlu0 %v481_v21, %s2680_s8 }
 0x2bf   :  { %v424_v32 = vpop.permute.xlu1 %423 }
 0x2c0   :  { %v3020_v33 = vsub.f32 %v2870_v6, %v424_v32  ;;  %v482_v34 = vpack.c.bf16 %v472_v25, %v471_v23  ;;  %v473_v43 = vmul.f32 %v3016_v30, %v3016_v30 }
 0x2c1   :  { %v426_v36 = vpop.permute.xlu0 %425 }
 0x2c2   :  { %v474_v44 = vmul.f32 %v3020_v33, %v3020_v33  ;;  %v3027_v46 = vsub.f32 %v2864_v0, %v426_v36  ;;  %503 = vrot.lane.b32.xlu1 %v482_v34, %s2680_s8 }
 0x2c3   :  { %v428_v52 = vpop.permute.xlu1 %427 }
 0x2c4   :  { %v3031_v56 = vsub.f32 %v2868_v4, %v428_v52  ;;  %v483_v63 = vpack.c.bf16 %v474_v44, %v473_v43  ;;  %v475_v3 = vmul.f32 %v3027_v46, %v3027_v46 }
 0x2c5   :  { %v976_v1 = vpop.permute.xlu0 %975 }
 0x2c6   :  { %v476_v5 = vmul.f32 %v3031_v56, %v3031_v56  ;;  %v3038_v10 = vsub.f32 %v2804_v37, %v976_v1  ;;  %505 = vrot.lane.b32.xlu0 %v483_v63, %s2680_s8 }
 0x2c7   :  { %v978_v12 = vpop.permute.xlu1 %977 }
 0x2c8   :  { %v3042_v13 = vsub.f32 %v2806_v38, %v978_v12  ;;  %v484_v14 = vpack.c.bf16 %v476_v5, %v475_v3  ;;  %v1039_v17 = vmul.f32 %v3038_v10, %v3038_v10 }
 0x2c9   :  { %v980_v15 = vpop.permute.xlu0 %979 }
 0x2ca   :  { %v1040_v21 = vmul.f32 %v3042_v13, %v3042_v13  ;;  %v3049_v22 = vsub.f32 %v2814_v41, %v980_v15  ;;  %507 = vrot.lane.b32.xlu1 %v484_v14, %s2680_s8 }
 0x2cb   :  { %v982_v37 = vpop.permute.xlu1 %981 }
 0x2cc   :  { %v3053_v23 = vsub.f32 %v2808_v39, %v982_v37  ;;  %v1055_v25 = vpack.c.bf16 %v1040_v21, %v1039_v17  ;;  %v1041_v32 = vmul.f32 %v3049_v22, %v3049_v22 }
 0x2cd   :  { %v984_v38 = vpop.permute.xlu0 %983 }
 0x2ce   :  { %v1042_v34 = vmul.f32 %v3053_v23, %v3053_v23  ;;  %v3060_v36 = vsub.f32 %v2822_v47, %v984_v38  ;;  %1071 = vrot.lane.b32.xlu0 %v1055_v25, %s2681_s9 }
 0x2cf   :  { %v986_v41 = vpop.permute.xlu1 %985 }
 0x2d0   :  { %v3064_v43 = vsub.f32 %v2824_v48, %v986_v41  ;;  %v1056_v44 = vpack.c.bf16 %v1042_v34, %v1041_v32  ;;  %v1043_v52 = vmul.f32 %v3060_v36, %v3060_v36 }
 0x2d1   :  { %v988_v39 = vpop.permute.xlu0 %987 }
 0x2d2   :  { %v1044_v63 = vmul.f32 %v3064_v43, %v3064_v43  ;;  %v3071_v1 = vsub.f32 %v2834_v51, %v988_v39  ;;  %1073 = vrot.lane.b32.xlu1 %v1056_v44, %s2681_s9 }
 0x2d3   :  { %v990_v47 = vpop.permute.xlu1 %989 }
 0x2d4   :  { %v3075_v3 = vsub.f32 %v2828_v49, %v990_v47  ;;  %v1057_v5 = vpack.c.bf16 %v1044_v63, %v1043_v52  ;;  %v1045_v12 = vmul.f32 %v3071_v1, %v3071_v1 }
 0x2d5   :  { %v992_v48 = vpop.permute.xlu0 %991 }
 0x2d6   :  { %v1046_v14 = vmul.f32 %v3075_v3, %v3075_v3  ;;  %v3082_v15 = vsub.f32 %v2840_v55, %v992_v48  ;;  %1075 = vrot.lane.b32.xlu0 %v1057_v5, %s2681_s9 }
 0x2d7   :  { %v994_v51 = vpop.permute.xlu1 %993 }
 0x2d8   :  { %v3086_v17 = vsub.f32 %v2848_v60, %v994_v51  ;;  %v1058_v21 = vpack.c.bf16 %v1046_v14, %v1045_v12  ;;  %v1047_v37 = vmul.f32 %v3082_v15, %v3082_v15 }
 0x2d9   :  { %v996_v49 = vpop.permute.xlu0 %995 }
 0x2da   :  { %v1048_v25 = vmul.f32 %v3086_v17, %v3086_v17  ;;  %v3093_v38 = vsub.f32 %v2838_v53, %v996_v49  ;;  %1077 = vrot.lane.b32.xlu1 %v1058_v21, %s2681_s9 }
 0x2db   :  { %v998_v55 = vpop.permute.xlu1 %997 }
 0x2dc   :  { %v3097_v32 = vsub.f32 %v2846_v58, %v998_v55  ;;  %v1059_v34 = vpack.c.bf16 %v1048_v25, %v1047_v37  ;;  %v1049_v41 = vmul.f32 %v3093_v38, %v3093_v38 }
 0x2dd   :  { %v1000_v60 = vpop.permute.xlu0 %999 }
 0x2de   :  { %v1050_v44 = vmul.f32 %v3097_v32, %v3097_v32  ;;  %v3104_v39 = vsub.f32 %v2866_v2, %v1000_v60  ;;  %1079 = vrot.lane.b32.xlu0 %v1059_v34, %s2681_s9 }
 0x2df   :  { %v1002_v53 = vpop.permute.xlu1 %1001 }
 0x2e0   :  { %v3108_v52 = vsub.f32 %v2870_v6, %v1002_v53  ;;  %v1060_v63 = vpack.c.bf16 %v1050_v44, %v1049_v41  ;;  %v1051_v47 = vmul.f32 %v3104_v39, %v3104_v39 }
 0x2e1   :  { %v1004_v58 = vpop.permute.xlu0 %1003 }
 0x2e2   :  { %v1052_v5 = vmul.f32 %v3108_v52, %v3108_v52  ;;  %v3115_v48 = vsub.f32 %v2864_v0, %v1004_v58  ;;  %1081 = vrot.lane.b32.xlu1 %v1060_v63, %s2681_s9 }
 0x2e3   :  { %v1006_v2 = vpop.permute.xlu1 %1005 }
 0x2e4   :  { %v3119_v12 = vsub.f32 %v2868_v4, %v1006_v2  ;;  %v1061_v14 = vpack.c.bf16 %v1052_v5, %v1051_v47  ;;  %v1053_v6 = vmul.f32 %v3115_v48, %v3115_v48  ;;  %v760_v5 = vsub.s32 1, %v2784_v28 }
 0x2e6   :  { %v1054_v51 = vmul.f32 %v3119_v12, %v3119_v12  ;;  %1083 = vrot.lane.b32.xlu0 %v1061_v14, %s2681_s9  ;;  %v761_v2 = vrot.slane %v2799_v31, %v760_v5  ;;  %v784_v14 = vsub.s32 2, %v2784_v28 }
 0x2e8   :  { %v1062_v21 = vpack.c.bf16 %v1054_v51, %v1053_v6  ;;  %v785_v6 = vrot.slane %v2799_v31, %v784_v14 }
 0x2ea   :  { %1085 = vrot.lane.b32.xlu1 %v1062_v21, %s2681_s9  ;;  %763 = vrot.lane.b32.xlu0 %v761_v2, %s2682_s10 }
 0x2ee   :  { %787 = vrot.lane.b32.xlu1 %v785_v6, %s2682_s10 }
 0x320   :  { %v494_v0 = vpop.permute.xlu0 %493 }
 0x321   :  { %2409 = vmatprep.mubr.msk.bf16.mxu0 %vm78_vm0, %v494_v0 }
 0x324   :  { %v496_v49 = vpop.permute.xlu1 %495 }
 0x325   :  { %2410 = vmatmul.mubr.msk.bf16.vlgmr.msra.gmra.mrb[16].mxu0 %vm78_vm0, %v496_v49 }
 0x326   :  { %2446 = vmatpush3.bf16.msra.mxu0 %v2778_v26 }
 0x327   :  { %2447 = vmatprep.subr.bf16.mxu0 %v2789_v29 }
 0x328   :  { %v498_v4 = vpop.permute.xlu0 %497 }
 0x329   :  { %2413 = vmatprep.mubr.msk.bf16.mxu0 %vm78_vm0, %v498_v4 }
 0x32a   :  { %2448 = vmatpush3.bf16.msra.mxu0 %v2789_v29 }
 0x32c   :  { %v500_v37 = vpop.permute.xlu1 %499 }
 0x32d   :  { %2414 = vmatmul.mubr.msk.bf16.gmra.mrb[20].mxu0 %vm78_vm0, %v500_v37 }
 0x330   :  { %v502_v25 = vpop.permute.xlu0 %501 }
 0x331   :  { %2417 = vmatprep.mubr.msk.bf16.mxu0 %vm78_vm0, %v502_v25 }
 0x334   :  { %v504_v55 = vpop.permute.xlu1 %503 }
 0x335   :  { %2418 = vmatmul.mubr.msk.bf16.gmra.mrb[24].mxu0 %vm78_vm0, %v504_v55 }
 0x338   :  { %v506_v34 = vpop.permute.xlu0 %505 }
 0x339   :  { %2421 = vmatprep.mubr.msk.bf16.mxu0 %vm78_vm0, %v506_v34 }
 0x33c   :  { %v508_v26 = vpop.permute.xlu1 %507 }
 0x33d   :  { %2422 = vmatmul.mubr.msk.bf16.gmra.mrb[28].mxu0 %vm78_vm0, %v508_v26 }
 0x340   :  { %v1072_v60 = vpop.permute.xlu0 %1071 }
 0x341   :  { %2449 = vmatprep.mubr.msk.bf16.mxu0 %vm78_vm0, %v1072_v60 }
 0x344   :  { %v1074_v41 = vpop.permute.xlu1 %1073 }
 0x345   :  { %2450 = vmatmul.mubr.msk.bf16.vlgmr.msra.gmra.mrb[32].mxu0 %vm78_vm0, %v1074_v41 }
 0x348   :  { %v1076_v29 = vpop.permute.xlu0 %1075 }
 0x349   :  { %2453 = vmatprep.mubr.msk.bf16.mxu0 %vm78_vm0, %v1076_v29 }
 0x34c   :  { %v1078_v44 = vpop.permute.xlu1 %1077 }
 0x34d   :  { %2454 = vmatmul.mubr.msk.bf16.gmra.mrb[36].mxu0 %vm78_vm0, %v1078_v44 }
 0x350   :  { %v1080_v53 = vpop.permute.xlu0 %1079 }
 0x351   :  { %2457 = vmatprep.mubr.msk.bf16.mxu0 %vm78_vm0, %v1080_v53 }
 0x354   :  { %v1082_v63 = vpop.permute.xlu1 %1081 }
 0x355   :  { %2458 = vmatmul.mubr.msk.bf16.gmra.mrb[40].mxu0 %vm78_vm0, %v1082_v63 }
 0x358   :  { %v1084_v58 = vpop.permute.xlu0 %1083 }
 0x359   :  { %2461 = vmatprep.mubr.msk.bf16.mxu0 %vm78_vm0, %v1084_v58 }
 0x35c   :  { %v1086_v47 = vpop.permute.xlu1 %1085 }
 0x35d   :  { %2462 = vmatmul.mubr.msk.bf16.gmra.mrb[44].mxu0 %vm78_vm0, %v1086_v47 }
 0x35e   :  { %2505 = vmatprep.mubr.msk.bf16.mxu0 %vm78_vm0, %v2858_v62 }
 0x3f8   :  { %v2411_v51 = vpop.f32.mrb[16].mxu0 }
 0x3f9   :  { %v632_v21 = vmul.f32 0.125, %v2411_v51  ;;  %v567_v0 = vpop.f32.mrb[17].mxu0 }
 0x3fa   :  { %v630_v49 = vmul.f32 0.125, %v567_v0  ;;  %v2412_v4 = vpop.f32.mrb[18].mxu0 }
 0x3fb   :  { %v648_v37 = vadd.f32 1e-05, %v632_v21  ;;  %v633_v25 = vmul.f32 0.125, %v2412_v4  ;;  %v570_v62 = vpop.f32.mrb[19].mxu0 }
 0x3fc   :  { %v631_v55 = vmul.f32 0.125, %v570_v62  ;;  %v646_v34 = vadd.f32 1e-05, %v630_v49 }
 0x3fd   :  { %2565 = vrsqrt.f32 %v648_v37  ;;  %v649_v26 = vadd.f32 1e-05, %v633_v25 }
 0x3fe   :  { %v647_v60 = vadd.f32 1e-05, %v631_v55 }
 0x3ff   :  { %2567 = vrsqrt.f32 %v649_v26 }
 0x400   :  { %v2415_v41 = vpop.f32.mrb[20].mxu0  ;;  %2569 = vrsqrt.f32 %v646_v34 }
 0x401   :  { %v636_v29 = vmul.f32 0.125, %v2415_v41  ;;  %v583_v44 = vpop.f32.mrb[21].mxu0  ;;  %2571 = vrsqrt.f32 %v647_v60 }
 0x402   :  { %v634_v53 = vmul.f32 0.125, %v583_v44  ;;  %v2416_v63 = vpop.f32.mrb[22].mxu0 }
 0x403   :  { %v652_v58 = vadd.f32 1e-05, %v636_v29  ;;  %v637_v47 = vmul.f32 0.125, %v2416_v63  ;;  %v586_v5 = vpop.f32.mrb[23].mxu0 }
 0x404   :  { %v650_v2 = vadd.f32 1e-05, %v634_v53  ;;  %v635_v14 = vmul.f32 0.125, %v586_v5 }
 0x405   :  { %2573 = vrsqrt.f32 %v652_v58  ;;  %v653_v21 = vadd.f32 1e-05, %v637_v47 }
 0x406   :  { %2575 = vrsqrt.f32 %v650_v2  ;;  %v651_v6 = vadd.f32 1e-05, %v635_v14 }
 0x407   :  { %v2566_v51 = vpop.eup %2565 }
 0x408   :  { %2577 = vrsqrt.f32 %v651_v6  ;;  %698 = vrot.lane.b32.xlu0 %v2566_v51, %s2682_s10  ;;  %v2419_v0 = vpop.f32.mrb[24].mxu0 }
 0x409   :  { %v2568_v49 = vpop.eup %2567  ;;  %v640_v4 = vmul.f32 0.125, %v2419_v0  ;;  %v599_v37 = vpop.f32.mrb[25].mxu0  ;;  %2579 = vrsqrt.f32 %v653_v21 }
 0x40a   :  { %v638_v25 = vmul.f32 0.125, %v599_v37  ;;  %700 = vrot.lane.b32.xlu1 %v2568_v49, %s2682_s10  ;;  %v2420_v62 = vpop.f32.mrb[26].mxu0  ;;  %v2570_v55 = vpop.eup %2569 }
 0x40b   :  { %v656_v34 = vadd.f32 1e-05, %v640_v4  ;;  %v641_v26 = vmul.f32 0.125, %v2420_v62  ;;  %v602_v60 = vpop.f32.mrb[27].mxu0  ;;  %v2572_v29 = vpop.eup %2571 }
 0x40c   :  { %v639_v41 = vmul.f32 0.125, %v602_v60  ;;  %694 = vrot.lane.b32.xlu0 %v2570_v55, %s2682_s10  ;;  %v654_v44 = vadd.f32 1e-05, %v638_v25 }
 0x40d   :  { %2581 = vrsqrt.f32 %v656_v34  ;;  %v657_v53 = vadd.f32 1e-05, %v641_v26 }
 0x40e   :  { %696 = vrot.lane.b32.xlu1 %v2572_v29, %s2682_s10  ;;  %v655_v58 = vadd.f32 1e-05, %v639_v41 }
 0x40f   :  { %v2574_v63 = vpop.eup %2573  ;;  %2583 = vrsqrt.f32 %v657_v53 }
 0x410   :  { %v2576_v47 = vpop.eup %2575  ;;  %706 = vrot.lane.b32.xlu0 %v2574_v63, %s2682_s10  ;;  %v2423_v5 = vpop.f32.mrb[28].mxu0  ;;  %2585 = vrsqrt.f32 %v654_v44 }
 0x411   :  { %v644_v2 = vmul.f32 0.125, %v2423_v5  ;;  %v615_v14 = vpop.f32.mrb[29].mxu0  ;;  %2587 = vrsqrt.f32 %v655_v58 }
 0x412   :  { %v2578_v6 = vpop.eup %2577  ;;  %v642_v51 = vmul.f32 0.125, %v615_v14  ;;  %702 = vrot.lane.b32.xlu1 %v2576_v47, %s2682_s10  ;;  %v2424_v21 = vpop.f32.mrb[30].mxu0 }
 0x413   :  { %v660_v0 = vadd.f32 1e-05, %v644_v2  ;;  %v618_v49 = vpop.f32.mrb[31].mxu0  ;;  %v645_v4 = vmul.f32 0.125, %v2424_v21  ;;  %v2580_v25 = vpop.eup %2579 }
 0x414   :  { %v643_v37 = vmul.f32 0.125, %v618_v49  ;;  %704 = vrot.lane.b32.xlu0 %v2578_v6, %s2682_s10  ;;  %v658_v62 = vadd.f32 1e-05, %v642_v51 }
 0x415   :  { %2589 = vrsqrt.f32 %v660_v0  ;;  %v661_v26 = vadd.f32 1e-05, %v645_v4  ;;  %v1338_v4 = vsub.s32 3, %v2784_v28 }
 0x416   :  { %v659_v55 = vadd.f32 1e-05, %v643_v37  ;;  %708 = vrot.lane.b32.xlu1 %v2580_v25, %s2682_s10 }
 0x417   :  { %v2582_v34 = vpop.eup %2581 }
 0x418   :  { %2591 = vrsqrt.f32 %v659_v55  ;;  %714 = vrot.lane.b32.xlu0 %v2582_v34, %s2682_s10  ;;  %v2451_v60 = vpop.f32.mrb[32].mxu0 }
 0x419   :  { %v2584_v41 = vpop.eup %2583  ;;  %2593 = vrsqrt.f32 %v658_v62  ;;  %v1210_v29 = vmul.f32 0.125, %v2451_v60  ;;  %v1145_v44 = vpop.f32.mrb[33].mxu0 }
 0x41a   :  { %v1208_v53 = vmul.f32 0.125, %v1145_v44  ;;  %716 = vrot.lane.b32.xlu1 %v2584_v41, %s2682_s10  ;;  %v2452_v63 = vpop.f32.mrb[34].mxu0  ;;  %v2586_v58 = vpop.eup %2585  ;;  %2595 = vrsqrt.f32 %v661_v26 }
 0x41b   :  { %v1148_v47 = vpop.f32.mrb[35].mxu0  ;;  %v1226_v5 = vadd.f32 1e-05, %v1210_v29  ;;  %v2588_v14 = vpop.eup %2587  ;;  %v1211_v51 = vmul.f32 0.125, %v2452_v63  ;;  %v1339_v29 = vrot.slane %v2799_v31, %v1338_v4 }
 0x41c   :  { %v1209_v2 = vmul.f32 0.125, %v1148_v47  ;;  %710 = vrot.lane.b32.xlu0 %v2586_v58, %s2682_s10  ;;  %v1224_v6 = vadd.f32 1e-05, %v1208_v53 }
 0x41d   :  { %2597 = vrsqrt.f32 %v1226_v5  ;;  %v1227_v37 = vadd.f32 1e-05, %v1211_v51 }
 0x41e   :  { %712 = vrot.lane.b32.xlu1 %v2588_v14, %s2682_s10  ;;  %v1225_v0 = vadd.f32 1e-05, %v1209_v2  ;;  %2599 = vrsqrt.f32 %v1224_v6 }
 0x41f   :  { %v2590_v21 = vpop.eup %2589 }
 0x420   :  { %722 = vrot.lane.b32.xlu0 %v2590_v21, %s2682_s10  ;;  %v2455_v49 = vpop.f32.mrb[36].mxu0  ;;  %2601 = vrsqrt.f32 %v1225_v0 }
 0x421   :  { %v1161_v25 = vpop.f32.mrb[37].mxu0  ;;  %2603 = vrsqrt.f32 %v1227_v37  ;;  %v1214_v44 = vmul.f32 0.125, %v2455_v49  ;;  %v1362_v49 = vsub.s32 4, %v2784_v28 }
 0x422   :  { %v2592_v62 = vpop.eup %2591  ;;  %v1212_v55 = vmul.f32 0.125, %v1161_v25  ;;  %v2456_v34 = vpop.f32.mrb[38].mxu0 }
 0x423   :  { %v2594_v26 = vpop.eup %2593  ;;  %720 = vrot.lane.b32.xlu1 %v2592_v62, %s2682_s10  ;;  %v1164_v60 = vpop.f32.mrb[39].mxu0  ;;  %v1215_v58 = vmul.f32 0.125, %v2456_v34  ;;  %v1230_v2 = vadd.f32 1e-05, %v1214_v44 }
 0x424   :  { %v1213_v41 = vmul.f32 0.125, %v1164_v60  ;;  %718 = vrot.lane.b32.xlu0 %v2594_v26, %s2682_s10  ;;  %v1228_v53 = vadd.f32 1e-05, %v1212_v55  ;;  %v2596_v63 = vpop.eup %2595  ;;  %v1363_v60 = vrot.slane %v2799_v31, %v1362_v49 }
 0x425   :  { %v1231_v37 = vadd.f32 1e-05, %v1215_v58 }
 0x426   :  { %v1229_v47 = vadd.f32 1e-05, %v1213_v41  ;;  %2605 = vrsqrt.f32 %v1228_v53 }
 0x427   :  { %724 = vrot.lane.b32.xlu1 %v2596_v63, %s2682_s10  ;;  %v2598_v6 = vpop.eup %2597 }
 0x428   :  { %1341 = vrot.lane.b32.xlu0 %v1339_v29, %s2681_s9  ;;  %v2459_v5 = vpop.f32.mrb[40].mxu0  ;;  %v2600_v0 = vpop.eup %2599  ;;  %2607 = vrsqrt.f32 %v1229_v47 }
 0x429   :  { %v1177_v14 = vpop.f32.mrb[41].mxu0  ;;  %2609 = vrsqrt.f32 %v1230_v2  ;;  %v1218_v62 = vmul.f32 0.125, %v2459_v5 }
 0x42a   :  { %v1216_v51 = vmul.f32 0.125, %v1177_v14  ;;  %v2460_v21 = vpop.f32.mrb[42].mxu0  ;;  %v2602_v34 = vpop.eup %2601  ;;  %2611 = vrsqrt.f32 %v1231_v37 }
 0x42b   :  { %1276 = vrot.lane.b32.xlu1 %v2598_v6, %s2681_s9  ;;  %v1180_v4 = vpop.f32.mrb[43].mxu0  ;;  %v2604_v26 = vpop.eup %2603  ;;  %v1219_v41 = vmul.f32 0.125, %v2460_v21  ;;  %v1234_v53 = vadd.f32 1e-05, %v1218_v62 }
 0x42c   :  { %v1217_v25 = vmul.f32 0.125, %v1180_v4  ;;  %1272 = vrot.lane.b32.xlu0 %v2600_v0, %s2681_s9  ;;  %v1232_v55 = vadd.f32 1e-05, %v1216_v51 }
 0x42d   :  { %v1235_v14 = vadd.f32 1e-05, %v1219_v41 }
 0x42e   :  { %v1233_v29 = vadd.f32 1e-05, %v1217_v25  ;;  %2613 = vrsqrt.f32 %v1232_v55 }
 0x42f   :  { %1274 = vrot.lane.b32.xlu1 %v2602_v34, %s2681_s9 }
 0x430   :  { %1278 = vrot.lane.b32.xlu0 %v2604_v26, %s2681_s9  ;;  %v2463_v44 = vpop.f32.mrb[44].mxu0  ;;  %v2606_v2 = vpop.eup %2605  ;;  %2615 = vrsqrt.f32 %v1233_v29 }
 0x431   :  { %v1193_v63 = vpop.f32.mrb[45].mxu0  ;;  %2617 = vrsqrt.f32 %v1234_v53  ;;  %v1222_v31 = vmul.f32 0.125, %v2463_v44 }
 0x432   :  { %v1220_v58 = vmul.f32 0.125, %v1193_v63  ;;  %v2464_v47 = vpop.f32.mrb[46].mxu0  ;;  %v2608_v21 = vpop.eup %2607  ;;  %2619 = vrsqrt.f32 %v1235_v14 }
 0x433   :  { %1365 = vrot.lane.b32.xlu1 %v1363_v60, %s2681_s9  ;;  %v1196_v5 = vpop.f32.mrb[47].mxu0  ;;  %v2610_v0 = vpop.eup %2609  ;;  %v1223_v4 = vmul.f32 0.125, %v2464_v47  ;;  %v1238_v37 = vadd.f32 1e-05, %v1222_v31 }
 0x434   :  { %v1221_v6 = vmul.f32 0.125, %v1196_v5  ;;  %1280 = vrot.lane.b32.xlu0 %v2606_v2, %s2681_s9  ;;  %v1236_v51 = vadd.f32 1e-05, %v1220_v58  ;;  %v2612_v25 = vpop.eup %2611  ;;  %v3192_v63 = vpop.permute.xlu0 %763 }
 0x435   :  { %v1239_v55 = vadd.f32 1e-05, %v1223_v4  ;;  %v3194_v58 = vpop.permute.xlu1 %787 }
 0x436   :  { %v1237_v49 = vadd.f32 1e-05, %v1221_v6  ;;  %2621 = vrsqrt.f32 %v1236_v51 }
 0x437   :  { %1282 = vrot.lane.b32.xlu1 %v2608_v21, %s2681_s9 }
 0x438   :  { %1284 = vrot.lane.b32.xlu0 %v2610_v0, %s2681_s9  ;;  %v2614_v62 = vpop.eup %2613  ;;  %2623 = vrsqrt.f32 %v1237_v49 }
 0x439   :  { %2625 = vrsqrt.f32 %v1238_v37 }
 0x43a   :  { %v2616_v34 = vpop.eup %2615  ;;  %2627 = vrsqrt.f32 %v1239_v55 }
 0x43b   :  { %1286 = vrot.lane.b32.xlu1 %v2612_v25, %s2681_s9  ;;  %v2618_v26 = vpop.eup %2617 }
 0x43c   :  { %1288 = vrot.lane.b32.xlu0 %v2614_v62, %s2681_s9  ;;  %v2620_v60 = vpop.eup %2619 }
 0x43f   :  { %1290 = vrot.lane.b32.xlu1 %v2616_v34, %s2681_s9 }
 0x440   :  { %1292 = vrot.lane.b32.xlu0 %v2618_v26, %s2681_s9  ;;  %v2622_v41 = vpop.eup %2621 }
 0x442   :  { %v2624_v29 = vpop.eup %2623 }
 0x443   :  { %1294 = vrot.lane.b32.xlu1 %v2620_v60, %s2681_s9  ;;  %v2626_v44 = vpop.eup %2625 }
 0x444   :  { %1296 = vrot.lane.b32.xlu0 %v2622_v41, %s2681_s9  ;;  %v2628_v53 = vpop.eup %2627 }
 0x447   :  { %1298 = vrot.lane.b32.xlu1 %v2624_v29, %s2681_s9 }
 0x448   :  { %1300 = vrot.lane.b32.xlu0 %v2626_v44, %s2681_s9 }
 0x44b   :  { %1302 = vrot.lane.b32.xlu1 %v2628_v53, %s2681_s9 }
 0x47a   :  { %v699_v47 = vpop.permute.xlu0 %698 }
 0x47b   :  { %v744_v2 = vmul.f32 %v699_v47, %v2962_v24 }
 0x47c   :  { %v701_v5 = vpop.permute.xlu1 %700 }
 0x47d   :  { %v768_v14 = vmul.f32 %v3192_v63, %v744_v2  ;;  %v745_v6 = vmul.f32 %v701_v5, %v2965_v27 }
 0x47e   :  { %v695_v31 = vpop.permute.xlu0 %694 }
 0x47f   :  { %v769_v51 = vmul.f32 %v3192_v63, %v745_v6  ;;  %v742_v21 = vmul.f32 %v695_v31, %v2952_v18  ;;  %v792_v4 = vadd.f32 %v3194_v58, %v768_v14 }
 0x480   :  { %v697_v0 = vpop.permute.xlu1 %696 }
 0x481   :  { %v793_v49 = vadd.f32 %v3194_v58, %v769_v51  ;;  %v766_v37 = vmul.f32 %v3192_v63, %v742_v21  ;;  %v743_v25 = vmul.f32 %v697_v0, %v2955_v20 }
 0x482   :  { %v707_v24 = vpop.permute.xlu0 %706 }
 0x483   :  { %v1385_v62 = vpack.c.bf16 %v793_v49, %v792_v4  ;;  %v767_v55 = vmul.f32 %v3192_v63, %v743_v25  ;;  %v748_v27 = vmul.f32 %v707_v24, %v2983_v54  ;;  %v790_v26 = vadd.f32 %v3194_v58, %v766_v37 }
 0x484   :  { %v703_v34 = vpop.permute.xlu1 %702 }
 0x485   :  { %v791_v18 = vadd.f32 %v3194_v58, %v767_v55  ;;  %v746_v60 = vmul.f32 %v703_v34, %v2972_v35  ;;  %1406 = vrot.lane.b32.xlu1 %v1385_v62, %s2680_s8  ;;  %v772_v53 = vmul.f32 %v3192_v63, %v748_v27 }
 0x486   :  { %v705_v41 = vpop.permute.xlu0 %704 }
 0x487   :  { %v1384_v29 = vpack.c.bf16 %v791_v18, %v790_v26  ;;  %v770_v44 = vmul.f32 %v3192_v63, %v746_v60  ;;  %v747_v20 = vmul.f32 %v705_v41, %v2976_v42  ;;  %v796_v42 = vadd.f32 %v3194_v58, %v772_v53 }
 0x488   :  { %v709_v47 = vpop.permute.xlu1 %708 }
 0x489   :  { %v771_v54 = vmul.f32 %v3192_v63, %v747_v20  ;;  %v749_v2 = vmul.f32 %v709_v47, %v2987_v59  ;;  %1404 = vrot.lane.b32.xlu0 %v1384_v29, %s2680_s8  ;;  %v794_v35 = vadd.f32 %v3194_v58, %v770_v44 }
 0x48a   :  { %v715_v5 = vpop.permute.xlu0 %714 }
 0x48b   :  { %v795_v14 = vadd.f32 %v3194_v58, %v771_v54  ;;  %v773_v6 = vmul.f32 %v3192_v63, %v749_v2  ;;  %v752_v31 = vmul.f32 %v715_v5, %v3005_v16 }
 0x48c   :  { %v717_v51 = vpop.permute.xlu1 %716 }
 0x48d   :  { %v1386_v21 = vpack.c.bf16 %v795_v14, %v794_v35  ;;  %v797_v0 = vadd.f32 %v3194_v58, %v773_v6  ;;  %v776_v4 = vmul.f32 %v3192_v63, %v752_v31  ;;  %v753_v59 = vmul.f32 %v717_v51, %v3009_v19 }
 0x48e   :  { %v711_v49 = vpop.permute.xlu0 %710 }
 0x48f   :  { %v1387_v37 = vpack.c.bf16 %v797_v0, %v796_v42  ;;  %v777_v25 = vmul.f32 %v3192_v63, %v753_v59  ;;  %v750_v24 = vmul.f32 %v711_v49, %v2994_v9  ;;  %1408 = vrot.lane.b32.xlu0 %v1386_v21, %s2680_s8  ;;  %v800_v16 = vadd.f32 %v3194_v58, %v776_v4 }
 0x490   :  { %v713_v62 = vpop.permute.xlu1 %712 }
 0x491   :  { %v801_v55 = vadd.f32 %v3194_v58, %v777_v25  ;;  %v774_v27 = vmul.f32 %v3192_v63, %v750_v24  ;;  %v751_v34 = vmul.f32 %v713_v62, %v2998_v11  ;;  %1410 = vrot.lane.b32.xlu1 %v1387_v37, %s2680_s8 }
 0x492   :  { %v723_v19 = vpop.permute.xlu0 %722 }
 0x493   :  { %v1389_v26 = vpack.c.bf16 %v801_v55, %v800_v16  ;;  %v775_v18 = vmul.f32 %v3192_v63, %v751_v34  ;;  %v798_v60 = vadd.f32 %v3194_v58, %v774_v27  ;;  %v756_v29 = vmul.f32 %v723_v19, %v3027_v46 }
 0x495   :  { %v799_v9 = vadd.f32 %v3194_v58, %v775_v18  ;;  %v721_v41 = vpop.permute.xlu1 %720  ;;  %1510 = vrot.lane.b32.xlu1 %v1389_v26, %s2680_s8  ;;  %v780_v5 = vmul.f32 %v3192_v63, %v756_v29 }
 0x496   :  { %v755_v44 = vmul.f32 %v721_v41, %v3020_v33  ;;  %v719_v20 = vpop.permute.xlu0 %718 }
 0x497   :  { %v1388_v53 = vpack.c.bf16 %v799_v9, %v798_v60  ;;  %v754_v11 = vmul.f32 %v719_v20, %v3016_v30  ;;  %v804_v42 = vadd.f32 %v3194_v58, %v780_v5 }
 0x498   :  { %v779_v47 = vmul.f32 %v3192_v63, %v755_v44 }
 0x499   :  { %v778_v54 = vmul.f32 %v3192_v63, %v754_v11  ;;  %v725_v2 = vpop.permute.xlu1 %724  ;;  %1508 = vrot.lane.b32.xlu0 %v1388_v53, %s2680_s8 }
 0x49a   :  { %v803_v35 = vadd.f32 %v3194_v58, %v779_v47  ;;  %v757_v14 = vmul.f32 %v725_v2, %v3031_v56  ;;  %v3246_v46 = vpop.permute.xlu0 %1341 }
 0x49b   :  { %v802_v33 = vadd.f32 %v3194_v58, %v778_v54 }
 0x49c   :  { %v781_v6 = vmul.f32 %v3192_v63, %v757_v14 }
 0x49d   :  { %v1390_v30 = vpack.c.bf16 %v803_v35, %v802_v33  ;;  %v1277_v31 = vpop.permute.xlu1 %1276 }
 0x49e   :  { %v805_v51 = vadd.f32 %v3194_v58, %v781_v6  ;;  %v1273_v21 = vpop.permute.xlu0 %1272  ;;  %v1322_v4 = vmul.f32 %v1277_v31, %v3049_v22 }
 0x49f   :  { %1512 = vrot.lane.b32.xlu0 %v1390_v30, %s2680_s8  ;;  %v1320_v56 = vmul.f32 %v1273_v21, %v3038_v10 }
 0x4a0   :  { %v1391_v0 = vpack.c.bf16 %v805_v51, %v804_v42  ;;  %v1346_v25 = vmul.f32 %v3246_v46, %v1322_v4 }
 0x4a1   :  { %v1275_v59 = vpop.permute.xlu1 %1274  ;;  %v1344_v58 = vmul.f32 %v3246_v46, %v1320_v56 }
 0x4a2   :  { %v1321_v49 = vmul.f32 %v1275_v59, %v3042_v13  ;;  %1514 = vrot.lane.b32.xlu1 %v1391_v0, %s2680_s8  ;;  %v1279_v63 = vpop.permute.xlu0 %1278 }
 0x4a3   :  { %v1323_v37 = vmul.f32 %v1279_v63, %v3053_v23 }
 0x4a4   :  { %v1345_v24 = vmul.f32 %v3246_v46, %v1321_v49 }
 0x4a5   :  { %v1347_v62 = vmul.f32 %v3246_v46, %v1323_v37  ;;  %v3262_v16 = vpop.permute.xlu1 %1365 }
 0x4a6   :  { %v1281_v22 = vpop.permute.xlu0 %1280  ;;  %v1368_v10 = vadd.f32 %v3262_v16, %v1344_v58  ;;  %v1369_v13 = vadd.f32 %v3262_v16, %v1345_v24  ;;  %v1370_v55 = vadd.f32 %v3262_v16, %v1346_v25 }
 0x4a7   :  { %v1324_v27 = vmul.f32 %v1281_v22, %v3060_v36  ;;  %v1371_v23 = vadd.f32 %v3262_v16, %v1347_v62 }
 0x4a8   :  { %v1392_v34 = vpack.c.bf16 %v1369_v13, %v1368_v10 }
 0x4a9   :  { %v1283_v19 = vpop.permute.xlu1 %1282  ;;  %v1393_v26 = vpack.c.bf16 %v1371_v23, %v1370_v55  ;;  %v1348_v18 = vmul.f32 %v3246_v46, %v1324_v27 }
 0x4aa   :  { %v1325_v60 = vmul.f32 %v1283_v19, %v3064_v43  ;;  %1436 = vrot.lane.b32.xlu0 %v1392_v34, %s2681_s9  ;;  %v1285_v9 = vpop.permute.xlu0 %1284 }
 0x4ab   :  { %v1326_v41 = vmul.f32 %v1285_v9, %v3071_v1  ;;  %1438 = vrot.lane.b32.xlu1 %v1393_v26, %s2681_s9  ;;  %v1372_v36 = vadd.f32 %v3262_v16, %v1348_v18 }
 0x4ac   :  { %v1349_v29 = vmul.f32 %v3246_v46, %v1325_v60 }
 0x4ad   :  { %v1287_v44 = vpop.permute.xlu1 %1286  ;;  %v1350_v53 = vmul.f32 %v3246_v46, %v1326_v41 }
 0x4ae   :  { %v1373_v20 = vadd.f32 %v3262_v16, %v1349_v29  ;;  %v1327_v11 = vmul.f32 %v1287_v44, %v3075_v3  ;;  %v1289_v47 = vpop.permute.xlu0 %1288 }
 0x4af   :  { %v1328_v43 = vmul.f32 %v1289_v47, %v3082_v15  ;;  %v1374_v5 = vadd.f32 %v3262_v16, %v1350_v53 }
 0x4b0   :  { %v1394_v54 = vpack.c.bf16 %v1373_v20, %v1372_v36  ;;  %v1351_v2 = vmul.f32 %v3246_v46, %v1327_v11 }
 0x4b1   :  { %v1291_v1 = vpop.permute.xlu1 %1290  ;;  %v1352_v14 = vmul.f32 %v3246_v46, %v1328_v43 }
 0x4b2   :  { %v1375_v35 = vadd.f32 %v3262_v16, %v1351_v2  ;;  %v1329_v33 = vmul.f32 %v1291_v1, %v3086_v17  ;;  %1440 = vrot.lane.b32.xlu0 %v1394_v54, %s2681_s9  ;;  %v1293_v6 = vpop.permute.xlu0 %1292 }
 0x4b3   :  { %v1330_v3 = vmul.f32 %v1293_v6, %v3093_v38  ;;  %v1376_v42 = vadd.f32 %v3262_v16, %v1352_v14  ;;  %v2662_v14 = vld [vmem:[%s3577_s4] sm:$0xff]  }
 0x4b4   :  { %v1395_v30 = vpack.c.bf16 %v1375_v35, %v1374_v5  ;;  %v1353_v15 = vmul.f32 %v3246_v46, %v1329_v33  ;;  %v2661_v5 = vld [vmem:[%s3577_s4 + $0x8] sm:$0xff]   ;;  %v50_v33 = vunpack.c.l.bf16 %v2662_v14 }
 0x4b5   :  { %v1295_v31 = vpop.permute.xlu1 %1294  ;;  %v1354_v21 = vmul.f32 %v3246_v46, %v1330_v3  ;;  %v52_v35 = vunpack.c.l.bf16 %v2661_v5  ;;  %v53_v6 = vunpack.c.h.bf16 %v2661_v5 }
 0x4b6   :  { %v1377_v51 = vadd.f32 %v3262_v16, %v1353_v15  ;;  %v1331_v0 = vmul.f32 %v1295_v31, %v3097_v32  ;;  %1442 = vrot.lane.b32.xlu1 %v1395_v30, %s2681_s9  ;;  %v1297_v17 = vpop.permute.xlu0 %1296  ;;  %v51_v30 = vunpack.c.h.bf16 %v2662_v14 }
 0x4b7   :  { %v1332_v4 = vmul.f32 %v1297_v17, %v3104_v39  ;;  %v1378_v49 = vadd.f32 %v3262_v16, %v1354_v21 }
 0x4b8   :  { %v1396_v56 = vpack.c.bf16 %v1377_v51, %v1376_v42  ;;  %v1355_v38 = vmul.f32 %v3246_v46, %v1331_v0 }
 0x4b9   :  { %v1299_v59 = vpop.permute.xlu1 %1298  ;;  %v1356_v37 = vmul.f32 %v3246_v46, %v1332_v4 }
 0x4ba   :  { %v1379_v63 = vadd.f32 %v3262_v16, %v1355_v38  ;;  %v1333_v25 = vmul.f32 %v1299_v59, %v3108_v52  ;;  %1540 = vrot.lane.b32.xlu0 %v1396_v56, %s2681_s9  ;;  %v1301_v32 = vpop.permute.xlu0 %1300 }
 0x4bb   :  { %v1334_v58 = vmul.f32 %v1301_v32, %v3115_v48  ;;  %v1380_v22 = vadd.f32 %v3262_v16, %v1356_v37 }
 0x4bc   :  { %v1397_v24 = vpack.c.bf16 %v1379_v63, %v1378_v49  ;;  %v1357_v39 = vmul.f32 %v3246_v46, %v1333_v25 }
 0x4bd   :  { %v1303_v62 = vpop.permute.xlu1 %1302  ;;  %v1358_v13 = vmul.f32 %v3246_v46, %v1334_v58 }
 0x4be   :  { %v1381_v10 = vadd.f32 %v3262_v16, %v1357_v39  ;;  %v1335_v55 = vmul.f32 %v1303_v62, %v3119_v12  ;;  %1542 = vrot.lane.b32.xlu1 %v1397_v24, %s2681_s9 }
 0x4bf   :  { %v1382_v23 = vadd.f32 %v3262_v16, %v1358_v13 }
 0x4c0   :  { %v1398_v52 = vpack.c.bf16 %v1381_v10, %v1380_v22  ;;  %v1359_v27 = vmul.f32 %v3246_v46, %v1335_v55 }
 0x4c2   :  { %v1383_v48 = vadd.f32 %v3262_v16, %v1359_v27  ;;  %1544 = vrot.lane.b32.xlu0 %v1398_v52, %s2681_s9 }
 0x4c4   :  { %v1399_v34 = vpack.c.bf16 %v1383_v48, %v1382_v23  ;;  %v3353_v48 = vld [vmem:[%s3576_s0 + $0x18] sm:$0xff] }
 0x4c6   :  { %1546 = vrot.lane.b32.xlu1 %v1399_v34, %s2681_s9 }
 0x4f7   :  { %v1407_v26 = vpop.permute.xlu1 %1406 }
 0x4fb   :  { %v1405_v19 = vpop.permute.xlu0 %1404 }
 0x4fc   :  { %1416 = vxpose.xlu0.c.b16.start [1/4] (short) (narrow) %v1405_v19, 32 }
 0x500   :  { %1417 = vxpose.xlu0.c.b16.cont [2/4] (short) (narrow) %v1407_v26, 32  ;;  %v3359_v26 = vld [vmem:[%s3576_s0] sm:$0xff] }
 0x501   :  { %v1409_v18 = vpop.permute.xlu0 %1408 }
 0x503   :  { %v1411_v12 = vpop.permute.xlu1 %1410 }
 0x504   :  { %1418 = vxpose.xlu0.c.b16.cont [3/4] (short) (narrow) %v1409_v18, 32 }
 0x507   :  { %v1511_v46 = vpop.permute.xlu1 %1510 }
 0x508   :  { %1419 = vxpose.xlu0.c.b16.end [4/4] (short) (narrow) %v1411_v12, 32  ;;  %v3365_v12 = vld [vmem:[%s3576_s0 + $0x8] sm:$0xff] }
 0x50b   :  { %v1509_v60 = vpop.permute.xlu0 %1508 }
 0x50c   :  { %1520 = vxpose.xlu1.c.b16.start [1/4] (short) (narrow) %v1509_v60, 32 }
 0x510   :  { %1521 = vxpose.xlu1.c.b16.cont [2/4] (short) (narrow) %v1511_v46, 32 }
 0x511   :  { %v1513_v9 = vpop.permute.xlu0 %1512 }
 0x514   :  { %1522 = vxpose.xlu1.c.b16.cont [3/4] (short) (narrow) %v1513_v9, 32  ;;  %v1515_v16 = vpop.permute.xlu1 %1514 }
 0x518   :  { %1523 = vxpose.xlu1.c.b16.end [4/4] (short) (narrow) %v1515_v16, 32 }
 0x51c   :  { %v1437_v41 = vpop.permute.xlu0 %1436 }
 0x51d   :  { %v1439_v29 = vpop.permute.xlu1 %1438  ;;  %2465 = vmatprep.subr.bf16.mxu1 %v1437_v41 }
 0x51e   :  { %2466 = vmatpush3.bf16.msra.mxu1 %v1437_v41 }
 0x51f   :  { %2467 = vmatprep.subr.bf16.mxu1 %v1439_v29 }
 0x522   :  { %2468 = vmatpush3.bf16.msra.mxu1 %v1439_v29 }
 0x524   :  { %v1441_v44 = vpop.permute.xlu0 %1440 }
 0x525   :  { %2469 = vmatprep.subr.bf16.mxu1 %v1441_v44 }
 0x526   :  { %2470 = vmatpush3.bf16.msra.mxu1 %v1441_v44  ;;  %v3373_v44 = vld [vmem:[%s3576_s0 + $0x30] sm:$0xff] }
 0x528   :  { %v1443_v36 = vpop.permute.xlu1 %1442 }
 0x529   :  { %2471 = vmatprep.subr.bf16.mxu1 %v1443_v36 }
 0x52a   :  { %2472 = vmatpush3.bf16.msra.mxu1 %v1443_v36 }
 0x52c   :  { %v1541_v20 = vpop.permute.xlu0 %1540 }
 0x52d   :  { %2477 = vmatprep.subr.bf16.mxu1 %v1541_v20 }
 0x530   :  { %v1543_v43 = vpop.permute.xlu1 %1542 }
 0x534   :  { %v1545_v53 = vpop.permute.xlu0 %1544 }
 0x538   :  { %v1547_v54 = vpop.permute.xlu1 %1546 }
 0x562   :  { %v1424_v11 = vpop.trf.xlu0 }
 0x563   :  { %2473 = vmatprep.mubr.msk.bf16.mxu1 %vm1448_vm1, %v1424_v11 }
 0x566   :  { %v1425_v47 = vpop.trf.xlu0 }
 0x567   :  { %2474 = vmatmul.mubr.msk.bf16.vlgmr.msra.gmra.mrb[32].mxu1 %vm1448_vm1, %v1425_v47  ;;  %v3385_v47 = vld [vmem:[%s3576_s0 + $0x20] sm:$0xff] }
 0x568   :  { %2478 = vmatpush3.bf16.msra.mxu1 %v1541_v20  ;;  %v3379_v20 = vld [vmem:[%s3576_s0 + $0x38] sm:$0xff] }
 0x569   :  { %2479 = vmatprep.subr.bf16.mxu1 %v1543_v43 }
 0x56c   :  { %2480 = vmatpush3.bf16.msra.mxu1 %v1543_v43 }
 0x56d   :  { %2481 = vmatprep.subr.bf16.mxu1 %v1545_v53 }
 0x570   :  { %2482 = vmatpush3.bf16.msra.mxu1 %v1545_v53 }
 0x571   :  { %2483 = vmatprep.subr.bf16.mxu1 %v1547_v54 }
 0x572   :  { %v1528_v2 = vpop.trf.xlu1 }
 0x573   :  { %2485 = vmatprep.mubr.msk.bf16.mxu1 %vm1448_vm1, %v1528_v2 }
 0x574   :  { %2484 = vmatpush3.bf16.msra.mxu1 %v1547_v54  ;;  %v3391_v54 = vld [vmem:[%s3576_s0 + $0x28] sm:$0xff] }
 0x576   :  { %v1529_v1 = vpop.trf.xlu1 }
 0x577   :  { %2486 = vmatmul.mubr.msk.bf16.vlgmr.msra.gmra.mrb[36].mxu1 %vm1448_vm1, %v1529_v1 }
 0x578   :  { %2493 = vmatprep.mubr.msk.bf16.mxu1 %vm78_vm0, %v2812_v40 }
 0x63a   :  { %v2475_v3 = vpop.f32.mrb[32].mxu1 }
 0x63b   :  { %v1609_v15 = vmul.f32 %v2475_v3, %v52_v35  ;;  %v1489_v31 = vpop.f32.mrb[33].mxu1 }
 0x63c   :  { %v1607_v42 = vmul.f32 %v1489_v31, %v50_v33  ;;  %v2476_v51 = vpop.f32.mrb[34].mxu1 }
 0x63d   :  { %v1610_v21 = vmul.f32 %v2476_v51, %v53_v6  ;;  %v1492_v0 = vpop.f32.mrb[35].mxu1  ;;  %v1617_v17 = vmul.f32 0.015625, %v1609_v15 }
 0x63e   :  { %v1608_v40 = vmul.f32 %v1492_v0, %v51_v30  ;;  %v1615_v56 = vmul.f32 0.015625, %v1607_v42  ;;  %v3411_v42 = vld [vmem:[%s3576_s0 + $0x40] sm:$0xff] }
 0x63f   :  { %v1618_v4 = vmul.f32 0.015625, %v1610_v21  ;;  %v3417_v21 = vld [vmem:[%s3576_s0 + $0x48] sm:$0xff] }
 0x640   :  { %v1616_v38 = vmul.f32 0.015625, %v1608_v40 }
 0x641   :  { %v1624_v59 = vpack.c.bf16 %v1618_v4, %v1617_v17 }
 0x642   :  { %v1623_v49 = vpack.c.bf16 %v1616_v38, %v1615_v56 }
 0x644   :  { %2489 = vmatprep.subr.bf16.mxu1 %v1623_v49 }
 0x645   :  { %2490 = vmatpush3.bf16.msra.mxu1 %v1623_v49 }
 0x646   :  { %2491 = vmatprep.subr.bf16.mxu1 %v1624_v59 }
 0x649   :  { %2492 = vmatpush3.bf16.msra.mxu1 %v1624_v59  ;;  %v3425_v59 = vld [vmem:[%s3576_s0 + $0x70] sm:$0xff] }
 0x64a   :  { %v2487_v63 = vpop.f32.mrb[36].mxu1 }
 0x64b   :  { %v1613_v37 = vmul.f32 %v2487_v63, %v52_v35  ;;  %v1592_v25 = vpop.f32.mrb[37].mxu1  ;;  %v3431_v63 = vld [vmem:[%s3576_s0 + $0x78] sm:$0xff] }
 0x64c   :  { %v1611_v32 = vmul.f32 %v1592_v25, %v50_v33  ;;  %v2488_v58 = vpop.f32.mrb[38].mxu1  ;;  %2494 = vmatmul.mubr.msk.bf16.vlgmr.msra.gmra.mrb[40].mxu1 %vm78_vm0, %v2820_v45  ;;  %v2561_v45 = vld [vmem:[%s3579_s2] sm:$0xff]  }
 0x64d   :  { %v1614_v24 = vmul.f32 %v2488_v58, %v53_v6  ;;  %v1595_v39 = vpop.f32.mrb[39].mxu1  ;;  %2497 = vmatprep.mubr.msk.bf16.mxu1 %vm78_vm0, %v2832_v50  ;;  %v1621_v22 = vmul.f32 0.015625, %v1613_v37  ;;  %2513 = vmatprep.subr.bf16.mxu1 %v2561_v45  ;;  %v2562_v50 = vld [vmem:[%s3579_s2 + $0x8] sm:$0xff]   ;;  %v3399_v6 = vld [vmem:[%s3576_s0 + $0x50] sm:$0xff] }
 0x64e   :  { %v1612_v62 = vmul.f32 %v1595_v39, %v51_v30  ;;  %v1619_v13 = vmul.f32 0.015625, %v1611_v32  ;;  %2034 = vrot.lane.b32.xlu0 %v2561_v45, %s2680_s8  ;;  %2514 = vmatpush3.bf16.msra.mxu1 %v2561_v45  ;;  %v3405_v30 = vld [vmem:[%s3576_s0 + $0x58] sm:$0xff]  ;;  %v3437_v32 = vld [vmem:[%s3576_s0 + $0x60] sm:$0xff] }
 0x64f   :  { %v1622_v10 = vmul.f32 0.015625, %v1614_v24  ;;  %2515 = vmatprep.subr.bf16.mxu1 %v2562_v50  ;;  %2036 = vrot.lane.b32.xlu1 %v2562_v50, %s2680_s8  ;;  %v3443_v24 = vld [vmem:[%s3576_s0 + $0x68] sm:$0xff] }
 0x650   :  { %v1620_v55 = vmul.f32 0.015625, %v1612_v62 }
 0x651   :  { %v1626_v52 = vpack.c.bf16 %v1622_v10, %v1621_v22 }
 0x652   :  { %v1625_v27 = vpack.c.bf16 %v1620_v55, %v1619_v13  ;;  %2516 = vmatpush3.bf16.msra.mxu1 %v2562_v50  ;;  %v1807_v55 = vsub.s32 5, %v2784_v28 }
 0x654   :  { %2498 = vmatmul.mubr.msk.bf16.gmra.mrb[44].mxu1 %vm78_vm0, %v2844_v57  ;;  %2501 = vmatprep.subr.bf16.mxu0 %v1625_v27 }
 0x655   :  { %2502 = vmatpush3.bf16.msra.mxu0 %v1625_v27 }
 0x656   :  { %2503 = vmatprep.subr.bf16.mxu0 %v1626_v52 }
 0x659   :  { %2504 = vmatpush3.bf16.msra.mxu0 %v1626_v52  ;;  %v3452_v52 = vld [vmem:[%s3578_s3] sm:$0xff] }
 0x65a   :  { %v3455_v27 = vrot.slane %v3452_v52, %v1807_v55 }
 0x65c   :  { %2506 = vmatmul.mubr.msk.bf16.vlgmr.msra.gmra.mrb[48].mxu0 %vm78_vm0, %v2854_v61 }
 0x65d   :  { %2509 = vmatprep.mubr.msk.bf16.mxu0 %vm78_vm0, %v2878_v8 }
 0x664   :  { %2510 = vmatmul.mubr.msk.bf16.gmra.mrb[52].mxu0 %vm78_vm0, %v2874_v7  ;;  %v3347_v7 = vld [vmem:[%s3576_s0 + $0x10] sm:$0xff] }
 0x6c0   :  { %v2035_v10 = vpop.permute.xlu0 %2034 }
 0x6c1   :  { %2533 = vmatprep.subr.bf16.mxu0 %v2035_v10  ;;  %v2037_v13 = vpop.permute.xlu1 %2036 }
 0x6c2   :  { %2534 = vmatpush3.bf16.msra.mxu0 %v2035_v10 }
 0x6c3   :  { %2535 = vmatprep.subr.bf16.mxu0 %v2037_v13 }
 0x6c6   :  { %2536 = vmatpush3.bf16.msra.mxu0 %v2037_v13 }
 0x71f   :  { %v2495_v57 = vpop.f32.mrb[40].mxu1 }
 0x720   :  { %v1673_v61 = vpop.f32.mrb[41].mxu1  ;;  %v1783_v23 = vadd.f32 %v3347_v7, %v2495_v57 }
 0x721   :  { %v2496_v8 = vpop.f32.mrb[42].mxu1  ;;  %v1781_v18 = vadd.f32 %v3359_v26, %v1673_v61 }
 0x722   :  { %v1784_v34 = vadd.f32 %v3353_v48, %v2496_v8  ;;  %v1676_v19 = vpop.f32.mrb[43].mxu1 }
 0x723   :  { %v1782_v60 = vadd.f32 %v3365_v12, %v1676_v19 }
 0x724   :  { %v1798_v46 = vpack.c.bf16 %v1784_v34, %v1783_v23 }
 0x725   :  { %v1797_v9 = vpack.c.bf16 %v1782_v60, %v1781_v18 }
 0x727   :  { %v2499_v16 = vpop.f32.mrb[44].mxu1  ;;  %2517 = vmatprep.mubr.msk.bf16.mxu1 %vm78_vm0, %v1797_v9 }
 0x728   :  { %v1689_v41 = vpop.f32.mrb[45].mxu1  ;;  %2518 = vmatmul.mubr.msk.bf16.vlgmr.msra.gmra.mrb[48].mxu1 %vm78_vm0, %v1798_v46  ;;  %v1787_v36 = vadd.f32 %v3373_v44, %v2499_v16 }
 0x729   :  { %v2500_v29 = vpop.f32.mrb[46].mxu1  ;;  %v1785_v43 = vadd.f32 %v3385_v47, %v1689_v41 }
 0x72a   :  { %v1788_v53 = vadd.f32 %v3379_v20, %v2500_v29  ;;  %v1692_v11 = vpop.f32.mrb[47].mxu1 }
 0x72b   :  { %v1786_v2 = vadd.f32 %v3391_v54, %v1692_v11 }
 0x72c   :  { %v1800_v1 = vpack.c.bf16 %v1788_v53, %v1787_v36 }
 0x72d   :  { %v1799_v5 = vpack.c.bf16 %v1786_v2, %v1785_v43 }
 0x72f   :  { %v2507_v35 = vpop.f32.mrb[48].mxu0  ;;  %2521 = vmatprep.mubr.msk.bf16.mxu1 %vm78_vm0, %v1799_v5 }
 0x730   :  { %v1750_v14 = vpop.f32.mrb[49].mxu0  ;;  %2522 = vmatmul.mubr.msk.bf16.gmra.mrb[52].mxu1 %vm78_vm0, %v1800_v1  ;;  %v1791_v3 = vadd.f32 %v3399_v6, %v2507_v35 }
 0x731   :  { %v2508_v33 = vpop.f32.mrb[50].mxu0  ;;  %v1789_v51 = vadd.f32 %v3411_v42, %v1750_v14 }
 0x732   :  { %v1792_v15 = vadd.f32 %v3405_v30, %v2508_v33  ;;  %v1753_v31 = vpop.f32.mrb[51].mxu0 }
 0x733   :  { %v1790_v0 = vadd.f32 %v3417_v21, %v1753_v31 }
 0x734   :  { %v1802_v40 = vpack.c.bf16 %v1792_v15, %v1791_v3 }
 0x735   :  { %v1801_v17 = vpack.c.bf16 %v1790_v0, %v1789_v51 }
 0x737   :  { %v2511_v4 = vpop.f32.mrb[52].mxu0  ;;  %2525 = vmatprep.mubr.msk.bf16.mxu1 %vm78_vm0, %v1801_v17 }
 0x738   :  { %v1766_v56 = vpop.f32.mrb[53].mxu0  ;;  %2526 = vmatmul.mubr.msk.bf16.gmra.mrb[56].mxu1 %vm78_vm0, %v1802_v40  ;;  %v1795_v49 = vadd.f32 %v3425_v59, %v2511_v4 }
 0x739   :  { %v2512_v38 = vpop.f32.mrb[54].mxu0  ;;  %v1793_v58 = vadd.f32 %v3437_v32, %v1766_v56 }
 0x73a   :  { %v1796_v37 = vadd.f32 %v3431_v63, %v2512_v38  ;;  %v1769_v25 = vpop.f32.mrb[55].mxu0 }
 0x73b   :  { %v1794_v39 = vadd.f32 %v3443_v24, %v1769_v25 }
 0x73c   :  { %v1804_v62 = vpack.c.bf16 %v1796_v37, %v1795_v49 }
 0x73d   :  { %v1803_v22 = vpack.c.bf16 %v1794_v39, %v1793_v58 }
 0x73f   :  { %2529 = vmatprep.mubr.msk.bf16.mxu1 %vm78_vm0, %v1803_v22 }
 0x740   :  { %2530 = vmatmul.mubr.msk.bf16.gmra.mrb[60].mxu1 %vm78_vm0, %v1804_v62 }
 0x7fb   :  { %v2519_v45 = vpop.f32.mrb[48].mxu1 }
 0x7fc   :  { %v1888_v50 = vadd.f32 %v2519_v45, %v3455_v27  ;;  %v1879_v57 = vpop.f32.mrb[49].mxu1 }
 0x7fd   :  { %v1880_v61 = vadd.f32 %v1879_v57, %v3455_v27  ;;  %v2520_v8 = vpop.f32.mrb[50].mxu1 }
 0x7fe   :  { %v1960_v23 = vmul.f32 0.70710677, %v1888_v50  ;;  %v1891_v34 = vadd.f32 %v2520_v8, %v3455_v27  ;;  %v1882_v19 = vpop.f32.mrb[51].mxu1  ;;  %v1944_v56 = vmul.f32 0.5, %v1888_v50 }
 0x7ff   :  { %v1958_v18 = vmul.f32 0.70710677, %v1880_v61  ;;  %v1883_v60 = vadd.f32 %v1882_v19, %v3455_v27  ;;  %v1942_v58 = vmul.f32 0.5, %v1880_v61 }
 0x800   :  { %2629 = verf.f32 %v1960_v23  ;;  %v1961_v46 = vmul.f32 0.70710677, %v1891_v34  ;;  %v1945_v38 = vmul.f32 0.5, %v1891_v34 }
 0x801   :  { %2631 = verf.f32 %v1958_v18  ;;  %v1959_v9 = vmul.f32 0.70710677, %v1883_v60  ;;  %v1943_v39 = vmul.f32 0.5, %v1883_v60 }
 0x802   :  { %2633 = verf.f32 %v1961_v46 }
 0x803   :  { %2635 = verf.f32 %v1959_v9  ;;  %v2523_v16 = vpop.f32.mrb[52].mxu1 }
 0x804   :  { %v1904_v41 = vadd.f32 %v2523_v16, %v3455_v27  ;;  %v1895_v29 = vpop.f32.mrb[53].mxu1 }
 0x805   :  { %v3463_v36 = vadd.f32 %v1895_v29, %v3455_v27  ;;  %v2524_v53 = vpop.f32.mrb[54].mxu1 }
 0x806   :  { %v1964_v11 = vmul.f32 0.70710677, %v1904_v41  ;;  %v1907_v43 = vadd.f32 %v2524_v53, %v3455_v27  ;;  %v1898_v2 = vpop.f32.mrb[55].mxu1 }
 0x807   :  { %v1962_v1 = vmul.f32 0.70710677, %v3463_v36  ;;  %v1899_v5 = vadd.f32 %v1898_v2, %v3455_v27 }
 0x808   :  { %2637 = verf.f32 %v1964_v11  ;;  %v1965_v35 = vmul.f32 0.70710677, %v1907_v43 }
 0x809   :  { %2639 = verf.f32 %v1962_v1  ;;  %v1963_v14 = vmul.f32 0.70710677, %v1899_v5 }
 0x80a   :  { %v2630_v33 = vpop.eup %2629  ;;  %2641 = verf.f32 %v1965_v35  ;;  %v1948_v35 = vmul.f32 0.5, %v1904_v41 }
 0x80b   :  { %v2632_v3 = vpop.eup %2631  ;;  %v1992_v15 = vadd.f32 1.0, %v2630_v33  ;;  %2643 = verf.f32 %v1963_v14  ;;  %v2527_v31 = vpop.f32.mrb[56].mxu1  ;;  %v1949_v14 = vmul.f32 0.5, %v1907_v43 }
 0x80c   :  { %v2634_v51 = vpop.eup %2633  ;;  %v1990_v0 = vadd.f32 1.0, %v2632_v3  ;;  %v3469_v40 = vadd.f32 %v2527_v31, %v3455_v27  ;;  %v1911_v17 = vpop.f32.mrb[57].mxu1  ;;  %v1946_v31 = vmul.f32 0.5, %v3463_v36 }
 0x80d   :  { %v2636_v4 = vpop.eup %2635  ;;  %v1993_v49 = vadd.f32 1.0, %v2634_v51  ;;  %v3472_v37 = vadd.f32 %v1911_v17, %v3455_v27  ;;  %v2528_v25 = vpop.f32.mrb[58].mxu1  ;;  %v2008_v13 = vmul.f32 %v1992_v15, %v1944_v56  ;;  %v1947_v51 = vmul.f32 0.5, %v1899_v5 }
 0x80e   :  { %v1991_v62 = vadd.f32 1.0, %v2636_v4  ;;  %v1968_v22 = vmul.f32 0.70710677, %v3469_v40  ;;  %v1914_v10 = vpop.f32.mrb[59].mxu1  ;;  %v1923_v57 = vadd.f32 %v2528_v25, %v3455_v27  ;;  %v2006_v8 = vmul.f32 %v1990_v0, %v1942_v58 }
 0x80f   :  { %v2009_v55 = vmul.f32 %v1993_v49, %v1945_v38  ;;  %v1966_v45 = vmul.f32 0.70710677, %v3472_v37  ;;  %v1915_v23 = vadd.f32 %v1914_v10, %v3455_v27 }
 0x810   :  { %v2007_v50 = vmul.f32 %v1991_v62, %v1943_v39  ;;  %2645 = verf.f32 %v1968_v22  ;;  %v1969_v19 = vmul.f32 0.70710677, %v1923_v57 }
 0x811   :  { %v2023_v34 = vpack.c.bf16 %v2009_v55, %v2008_v13  ;;  %2647 = verf.f32 %v1966_v45  ;;  %v1967_v60 = vmul.f32 0.70710677, %v1915_v23 }
 0x812   :  { %v2638_v61 = vpop.eup %2637  ;;  %v2022_v18 = vpack.c.bf16 %v2007_v50, %v2006_v8  ;;  %2649 = verf.f32 %v1969_v19  ;;  %v1952_v50 = vmul.f32 0.5, %v3469_v40  ;;  %v1950_v19 = vmul.f32 0.5, %v3472_v37 }
 0x813   :  { %v2640_v46 = vpop.eup %2639  ;;  %v1996_v9 = vadd.f32 1.0, %v2638_v61  ;;  %v2531_v16 = vpop.f32.mrb[60].mxu1  ;;  %2651 = verf.f32 %v1967_v60  ;;  %v1951_v61 = vmul.f32 0.5, %v1915_v23 }
 0x814   :  { %v2642_v29 = vpop.eup %2641  ;;  %v1994_v53 = vadd.f32 1.0, %v2640_v46  ;;  %v1936_v11 = vadd.f32 %v2531_v16, %v3455_v27  ;;  %v1927_v2 = vpop.f32.mrb[61].mxu1  ;;  %2537 = vmatprep.mubr.msk.bf16.mxu0 %vm78_vm0, %v2022_v18 }
 0x815   :  { %v2644_v1 = vpop.eup %2643  ;;  %v1997_v33 = vadd.f32 1.0, %v2642_v29  ;;  %v1928_v3 = vadd.f32 %v1927_v2, %v3455_v27  ;;  %v2532_v15 = vpop.f32.mrb[62].mxu1  ;;  %2538 = vmatmul.mubr.msk.bf16.vlgmr.msra.gmra.mrb[56].mxu0 %vm78_vm0, %v2023_v34  ;;  %v2012_v56 = vmul.f32 %v1996_v9, %v1948_v35 }
 0x816   :  { %v1995_v0 = vadd.f32 1.0, %v2644_v1  ;;  %v1972_v17 = vmul.f32 0.70710677, %v1936_v11  ;;  %v1930_v4 = vpop.f32.mrb[63].mxu1  ;;  %v1939_v25 = vadd.f32 %v2532_v15, %v3455_v27  ;;  %v2010_v58 = vmul.f32 %v1994_v53, %v1946_v31 }
 0x817   :  { %v2013_v38 = vmul.f32 %v1997_v33, %v1949_v14  ;;  %v1970_v49 = vmul.f32 0.70710677, %v1928_v3  ;;  %v1931_v43 = vadd.f32 %v1930_v4, %v3455_v27  ;;  %v1953_v27 = vmul.f32 0.5, %v1923_v57 }
 0x818   :  { %v2011_v41 = vmul.f32 %v1995_v0, %v1947_v51  ;;  %2653 = verf.f32 %v1972_v17  ;;  %v1973_v62 = vmul.f32 0.70710677, %v1939_v25  ;;  %v1956_v57 = vmul.f32 0.5, %v1936_v11 }
 0x819   :  { %v2025_v39 = vpack.c.bf16 %v2013_v38, %v2012_v56  ;;  %2655 = verf.f32 %v1970_v49  ;;  %v1971_v36 = vmul.f32 0.70710677, %v1931_v43  ;;  %v1957_v15 = vmul.f32 0.5, %v1939_v25 }
 0x81a   :  { %v2646_v22 = vpop.eup %2645  ;;  %v2024_v10 = vpack.c.bf16 %v2011_v41, %v2010_v58  ;;  %2657 = verf.f32 %v1973_v62  ;;  %v1954_v37 = vmul.f32 0.5, %v1928_v3  ;;  %v1955_v23 = vmul.f32 0.5, %v1931_v43 }
 0x81b   :  { %v2648_v5 = vpop.eup %2647  ;;  %v2000_v13 = vadd.f32 1.0, %v2646_v22  ;;  %2659 = verf.f32 %v1971_v36  ;;  %v2032_v58 = vsub.s32 6, %v2784_v28 }
 0x81c   :  { %2541 = vmatprep.mubr.msk.bf16.mxu0 %vm78_vm0, %v2024_v10  ;;  %v2650_v55 = vpop.eup %2649  ;;  %v1998_v45 = vadd.f32 1.0, %v2648_v5 }
 0x81d   :  { %2542 = vmatmul.mubr.msk.bf16.gmra.mrb[60].mxu0 %vm78_vm0, %v2025_v39  ;;  %v2652_v8 = vpop.eup %2651  ;;  %v2001_v34 = vadd.f32 1.0, %v2650_v55  ;;  %v2016_v60 = vmul.f32 %v2000_v13, %v1952_v50  ;;  %v2033_v11 = vrot.slane %v3452_v52, %v2032_v58 }
 0x81e   :  { %v1999_v18 = vadd.f32 1.0, %v2652_v8  ;;  %v2014_v9 = vmul.f32 %v1998_v45, %v1950_v19 }
 0x81f   :  { %v2017_v46 = vmul.f32 %v2001_v34, %v1953_v27 }
 0x820   :  { %v2015_v16 = vmul.f32 %v1999_v18, %v1951_v61 }
 0x821   :  { %v2027_v53 = vpack.c.bf16 %v2017_v46, %v2016_v60 }
 0x822   :  { %v2654_v29 = vpop.eup %2653  ;;  %v2026_v1 = vpack.c.bf16 %v2015_v16, %v2014_v9 }
 0x823   :  { %v2656_v2 = vpop.eup %2655  ;;  %v2004_v35 = vadd.f32 1.0, %v2654_v29 }
 0x824   :  { %v2658_v14 = vpop.eup %2657  ;;  %v2002_v33 = vadd.f32 1.0, %v2656_v2  ;;  %2545 = vmatprep.mubr.msk.bf16.mxu0 %vm78_vm0, %v2026_v1 }
 0x825   :  { %v2660_v40 = vpop.eup %2659  ;;  %v2005_v31 = vadd.f32 1.0, %v2658_v14  ;;  %2546 = vmatmul.mubr.msk.bf16.gmra.mrb[64].mxu0 %vm78_vm0, %v2027_v53  ;;  %v2020_v0 = vmul.f32 %v2004_v35, %v1956_v57 }
 0x826   :  { %v2003_v51 = vadd.f32 1.0, %v2660_v40  ;;  %v2018_v4 = vmul.f32 %v2002_v33, %v1954_v37 }
 0x827   :  { %v2021_v17 = vmul.f32 %v2005_v31, %v1957_v15 }
 0x828   :  { %v2019_v56 = vmul.f32 %v2003_v51, %v1955_v23 }
 0x829   :  { %v2029_v38 = vpack.c.bf16 %v2021_v17, %v2020_v0 }
 0x82a   :  { %v2028_v49 = vpack.c.bf16 %v2019_v56, %v2018_v4 }
 0x82c   :  { %2549 = vmatprep.mubr.msk.bf16.mxu0 %vm78_vm0, %v2028_v49 }
 0x82d   :  { %2550 = vmatmul.mubr.msk.bf16.gmra.mrb[68].mxu0 %vm78_vm0, %v2029_v38 }
 0x8e8   :  { %v2539_v25 = vpop.f32.mrb[56].mxu0 }
 0x8e9   :  { %v2107_v41 = vadd.f32 %v2539_v25, %v2033_v11  ;;  %v2098_v39 = vpop.f32.mrb[57].mxu0 }
 0x8ea   :  { %v2099_v3 = vadd.f32 %v2098_v39, %v2033_v11  ;;  %v2540_v43 = vpop.f32.mrb[58].mxu0 }
 0x8eb   :  { %v2163_v62 = vadd.f32 %v3347_v7, %v2107_v41  ;;  %v2110_v22 = vadd.f32 %v2540_v43, %v2033_v11  ;;  %v2101_v10 = vpop.f32.mrb[59].mxu0 }
 0x8ec   :  { %v2161_v36 = vadd.f32 %v3359_v26, %v2099_v3  ;;  %v2102_v5 = vadd.f32 %v2101_v10, %v2033_v11 }
 0x8ed   :  { %2179 = vst.msk [vmem:[%s3580_s5 + $0x10] sm:$0xff] %vm78_vm0, %v2163_v62  ;;  %v2164_v28 = vadd.f32 %v3353_v48, %v2110_v22 }
 0x8ee   :  { %2177 = vst.msk [vmem:[%s3580_s5] sm:$0xff] %vm78_vm0, %v2161_v36  ;;  %v2162_v52 = vadd.f32 %v3365_v12, %v2102_v5 }
 0x8ef   :  { %2180 = vst.msk [vmem:[%s3580_s5 + $0x18] sm:$0xff] %vm78_vm0, %v2164_v28 }
 0x8f0   :  { %2178 = vst.msk [vmem:[%s3580_s5 + $0x8] sm:$0xff] %vm78_vm0, %v2162_v52  ;;  %v2543_v7 = vpop.f32.mrb[60].mxu0 }
 0x8f1   :  { %v2123_v26 = vadd.f32 %v2543_v7, %v2033_v11  ;;  %v2114_v48 = vpop.f32.mrb[61].mxu0 }
 0x8f2   :  { %v2115_v13 = vadd.f32 %v2114_v48, %v2033_v11  ;;  %v2544_v55 = vpop.f32.mrb[62].mxu0 }
 0x8f3   :  { %v2167_v45 = vadd.f32 %v3373_v44, %v2123_v26  ;;  %v2126_v8 = vadd.f32 %v2544_v55, %v2033_v11  ;;  %v2117_v50 = vpop.f32.mrb[63].mxu0 }
 0x8f4   :  { %v2165_v12 = vadd.f32 %v3385_v47, %v2115_v13  ;;  %v2118_v27 = vadd.f32 %v2117_v50, %v2033_v11 }
 0x8f5   :  { %2183 = vst.msk [vmem:[%s3580_s5 + $0x30] sm:$0xff] %vm78_vm0, %v2167_v45  ;;  %v2168_v34 = vadd.f32 %v3379_v20, %v2126_v8 }
 0x8f6   :  { %2181 = vst.msk [vmem:[%s3580_s5 + $0x20] sm:$0xff] %vm78_vm0, %v2165_v12  ;;  %v2166_v19 = vadd.f32 %v3391_v54, %v2118_v27 }
 0x8f7   :  { %2184 = vst.msk [vmem:[%s3580_s5 + $0x38] sm:$0xff] %vm78_vm0, %v2168_v34 }
 0x8f8   :  { %2182 = vst.msk [vmem:[%s3580_s5 + $0x28] sm:$0xff] %vm78_vm0, %v2166_v19  ;;  %v2547_v44 = vpop.f32.mrb[64].mxu0 }
 0x8f9   :  { %v2139_v47 = vadd.f32 %v2547_v44, %v2033_v11  ;;  %v2130_v20 = vpop.f32.mrb[65].mxu0 }
 0x8fa   :  { %v2131_v61 = vadd.f32 %v2130_v20, %v2033_v11  ;;  %v2548_v18 = vpop.f32.mrb[66].mxu0 }
 0x8fb   :  { %v2171_v60 = vadd.f32 %v3399_v6, %v2139_v47  ;;  %v2142_v46 = vadd.f32 %v2548_v18, %v2033_v11  ;;  %v2133_v9 = vpop.f32.mrb[67].mxu0 }
 0x8fc   :  { %v2169_v54 = vadd.f32 %v3411_v42, %v2131_v61  ;;  %v2134_v16 = vadd.f32 %v2133_v9, %v2033_v11 }
 0x8fd   :  { %2187 = vst.msk [vmem:[%s3580_s5 + $0x50] sm:$0xff] %vm78_vm0, %v2171_v60  ;;  %v2172_v29 = vadd.f32 %v3405_v30, %v2142_v46 }
 0x8fe   :  { %2185 = vst.msk [vmem:[%s3580_s5 + $0x40] sm:$0xff] %vm78_vm0, %v2169_v54  ;;  %v2170_v53 = vadd.f32 %v3417_v21, %v2134_v16 }
 0x8ff   :  { %2188 = vst.msk [vmem:[%s3580_s5 + $0x58] sm:$0xff] %vm78_vm0, %v2172_v29 }
 0x900   :  { %2186 = vst.msk [vmem:[%s3580_s5 + $0x48] sm:$0xff] %vm78_vm0, %v2170_v53  ;;  %v2551_v6 = vpop.f32.mrb[68].mxu0 }
 0x901   :  { %v2155_v42 = vadd.f32 %v2551_v6, %v2033_v11  ;;  %v2146_v30 = vpop.f32.mrb[69].mxu0 }
 0x902   :  { %v2147_v2 = vadd.f32 %v2146_v30, %v2033_v11  ;;  %v2552_v1 = vpop.f32.mrb[70].mxu0 }
 0x903   :  { %v2175_v35 = vadd.f32 %v3425_v59, %v2155_v42  ;;  %v2158_v14 = vadd.f32 %v2552_v1, %v2033_v11  ;;  %v2149_v33 = vpop.f32.mrb[71].mxu0 }
 0x904   :  { %v2173_v21 = vadd.f32 %v3437_v32, %v2147_v2  ;;  %v2150_v40 = vadd.f32 %v2149_v33, %v2033_v11 }
 0x905   :  { %2191 = vst.msk [vmem:[%s3580_s5 + $0x70] sm:$0xff] %vm78_vm0, %v2175_v35  ;;  %v2176_v57 = vadd.f32 %v3431_v63, %v2158_v14 }
 0x906   :  { %2189 = vst.msk [vmem:[%s3580_s5 + $0x60] sm:$0xff] %vm78_vm0, %v2173_v21  ;;  %v2174_v15 = vadd.f32 %v3443_v24, %v2150_v40 }
 0x907   :  { %2192 = vst.msk [vmem:[%s3580_s5 + $0x78] sm:$0xff] %vm78_vm0, %v2176_v57 }
 0x908   :  { %2190 = vst.msk [vmem:[%s3580_s5 + $0x68] sm:$0xff] %vm78_vm0, %v2174_v15 }

</bundles_post_ra>
